<compile_context>
chip_gen: v5e
topology: v5e:2x2
jax: 0.10.0
libtpu: 0.0.40
codegen_flags: <defaults>
</compile_context>

<pallas_src>
import jax
import jax.numpy as jnp
from jax import lax
from jax.experimental import pallas as pl
from jax.experimental.pallas import tpu as pltpu


# ----------------------------- kernel ----------------------------------------

def _make_transition_kernel(Ktot, cA):
    KcA = Ktot * cA

    def kernel(uniq_ref, w1_ref, b1_ref, w2_ref, b2_ref, wi_ref, bi_ref,
               afrom_ref, ato_ref, mask_ref,
               init_ref, trans_ref,
               cond_s, nf_s, ntT_s):
        x = uniq_ref[...]                                           # (bsz, emb)

        # ---- init_lin + log-softmax over K (shares the single x load) ----
        s = jnp.dot(x, wi_ref[...], preferred_element_type=jnp.float32) + bi_ref[...]
        ms = jnp.max(s, axis=-1, keepdims=True)
        init_ref[...] = s - ms - jnp.log(
            jnp.sum(jnp.exp(s - ms), axis=-1, keepdims=True))

        # ---- cond_trans_lin: Linear -> ReLU -> Linear, ONE fused wide dot.
        #      W2/b2 columns are pre-permuted so [:, :KcA] is nufrom (k-major)
        #      and [:, KcA:] is nuto^T (d-major): no in-kernel transpose needed.
        h = jnp.dot(x, w1_ref[...], preferred_element_type=jnp.float32) + b1_ref[...]
        h = jnp.maximum(h, 0.0)                                     # ReLU
        cond_s[...] = (jnp.dot(h, w2_ref[...], preferred_element_type=jnp.float32)
                       + b2_ref[...])                               # (bsz, 2*K*cA)

        # layout change (bsz, 2*K*cA) -> (bsz,K,cA) / (bsz,cA,K) via small
        # static ref copies (trace-time unrolled; tiny shapes).
        for k in range(Ktot):
            nf_s[:, k, :] = cond_s[:, k * cA:(k + 1) * cA]
        for d in range(cA):
            ntT_s[:, d, :] = cond_s[:, KcA + d * Ktot:KcA + (d + 1) * Ktot]

        # ---- batch-invariant transition scores: computed ONCE ----
        tsc = (jnp.dot(afrom_ref[...], ato_ref[...],
                       preferred_element_type=jnp.float32)
               + mask_ref[...])                                     # (K, K), -inf diag

        # ---- batched nu = nufrom @ nuto^T for the WHOLE batch, then row
        #      log-softmax over the "to" axis ----
        nu = lax.dot_general(nf_s[...], ntT_s[...],
                             dimension_numbers=(((2,), (1,)), ((0,), (0,))),
                             preferred_element_type=jnp.float32)    # (bsz, K, K)
        t = tsc[None, :, :] + nu
        mt = jnp.max(t, axis=-1, keepdims=True)
        trans_ref[...] = t - mt - jnp.log(
            jnp.sum(jnp.exp(t - mt), axis=-1, keepdims=True))

    return kernel


# ----------------------------- param prep ------------------------------------

def prepare_params(raw_params):
    """One-time (trace-level) repack of torch-layout params into kernel layout.

    The second cond_trans_lin layer is fused into a single (sc, 2*K*cA) matrix:
      columns [:K*cA]  -> nufrom, flattened k-major (torch's [:, :, :cA]),
      columns [K*cA:]  -> nuto TRANSPOSED, flattened d-major, so the kernel
                          reads nuto^T directly (no XLU transpose per batch).
    """
    w1, b1, w2, b2, wi, bi, a_from, a_to, selfmask = raw_params
    sc = w2.shape[0]
    Ktot = a_from.shape[0]
    cA = (w2.shape[1] // Ktot) // 2

    w3 = w2.reshape(sc, Ktot, 2 * cA)
    b3 = b2.reshape(1, Ktot, 2 * cA)
    wf = w3[:, :, :cA].reshape(sc, Ktot * cA)
    bf = b3[:, :, :cA].reshape(1, Ktot * cA)
    wt = jnp.transpose(w3[:, :, cA:], (0, 2, 1)).reshape(sc, cA * Ktot)
    bt = jnp.transpose(b3[:, :, cA:], (0, 2, 1)).reshape(1, cA * Ktot)
    w2p = jnp.concatenate([wf, wt], axis=1)
    b2p = jnp.concatenate([bf, bt], axis=1)
    return (w1, b1, w2p, b2p, wi, bi, a_from, a_to, selfmask)


# ----------------------------- wrapper ---------------------------------------

def transition_forward(uniqenc, seqlen, prepped, *, expand_seq=False):
    w1, b1, w2p, b2p, wi, bi, a_from, a_to, selfmask = prepped
    bsz = uniqenc.shape[0]
    Ktot = a_from.shape[0]
    cA = w2p.shape[1] // (2 * Ktot)

    vmem = pl.BlockSpec(memory_space=pltpu.MemorySpace.VMEM)
    kernel = _make_transition_kernel(Ktot, cA)

    init_logps, trans_lps = pl.pallas_call(
        kernel,
        out_shape=(jax.ShapeDtypeStruct((bsz, Ktot), jnp.float32),
                   jax.ShapeDtypeStruct((bsz, Ktot, Ktot), jnp.float32)),
        in_specs=[vmem] * 10,
        out_specs=(vmem, vmem),
        scratch_shapes=[pltpu.VMEM((bsz, 2 * Ktot * cA), jnp.float32),
                        pltpu.VMEM((bsz, Ktot, cA), jnp.float32),
                        pltpu.VMEM((bsz, cA, Ktot), jnp.float32)],
    )(uniqenc, w1, b1, w2p, b2p, wi, bi, a_from, a_to, selfmask)

    if expand_seq:
        # torch's .view(1,bsz,K,K).expand(seqlen-1,...) is a VIEW; materializing
        # it multiplies HBM writes by (seqlen-1).  Only do it on request; the
        # default returns the compact (bsz,K,K) tensor for lazy broadcasting.
        trans_logps = jnp.broadcast_to(trans_lps[None],
                                       (seqlen - 1, bsz, Ktot, Ktot))
        return init_logps, trans_logps
    return init_logps, trans_lps


# ------------------------- params / reference --------------------------------

def make_params(key, emb_size, smaller_cond_dim, K, Kmul, cond_A_dim, A_dim,
                yes_self_trans=False, initrange=0.1):
    Ktot = K * Kmul
    ks = jax.random.split(key, 8)
    u = lambda k, shp: jax.random.uniform(k, shp, jnp.float32, -initrange, initrange)

    w1 = u(ks[0], (emb_size, smaller_cond_dim))
    b1 = u(ks[1], (1, smaller_cond_dim))
    w2 = u(ks[2], (smaller_cond_dim, Ktot * cond_A_dim * 2))
    b2 = u(ks[3], (1, Ktot * cond_A_dim * 2))
    wi = u(ks[4], (emb_size, Ktot))
    bi = u(ks[5], (1, Ktot))
    a_from = u(ks[6], (Ktot, A_dim))
    a_to = u(ks[7], (A_dim, Ktot))

    if yes_self_trans:
        selfmask = jnp.zeros((Ktot, Ktot), jnp.float32)
    else:
        selfmask = jnp.where(jnp.eye(Ktot, dtype=bool),
                             -jnp.inf, 0.0).astype(jnp.float32)

    # TODO(synk): nn.Dropout on A_from / nufrom is omitted (dropout=0.0 here).
    return (w1, b1, w2, b2, wi, bi, a_from, a_to, selfmask)


def reference_forward(uniqenc, seqlen, raw_params):
    w1, b1, w2, b2, wi, bi, a_from, a_to, selfmask = raw_params
    bsz = uniqenc.shape[0]
    Ktot = a_from.shape[0]
    cA = (w2.shape[1] // Ktot) // 2
    h = jnp.maximum(uniqenc @ w1 + b1, 0.0)
    cond = (h @ w2 + b2).reshape(bsz, Ktot, 2 * cA)
    nufrom, nuto = cond[:, :, :cA], cond[:, :, cA:]
    tscores = a_from @ a_to + selfmask
    t = tscores[None] + jnp.einsum('bkd,bjd->bkj', nufrom, nuto)
    trans = jax.nn.log_softmax(t, axis=-1)
    init = jax.nn.log_softmax(uniqenc @ wi + bi, axis=-1)
    return init, jnp.broadcast_to(trans[None], (seqlen - 1, bsz, Ktot, Ktot))


# --------------------------------- main ---------------------------------------

if __name__ == "__main__":
    # module config (small, consistent with Transition.__init__)
    emb_size, smaller_cond_dim = 32, 16
    K, Kmul, cond_A_dim, A_dim = 8, 2, 8, 8
    bsz, seqlen = 2, 6
    Ktot = K * Kmul

    key = jax.random.PRNGKey(0)
    k_par, k_in = jax.random.split(key)
    raw_params = make_params(k_par, emb_size, smaller_cond_dim, K, Kmul,
                             cond_A_dim, A_dim, yes_self_trans=False)
    prepped = prepare_params(raw_params)
    uniqenc = jax.random.normal(k_in, (bsz, emb_size), jnp.float32)

    # compact result (feedback: don't materialize the seqlen-1 expansion)
    init_logps, trans_lps = transition_forward(uniqenc, seqlen, prepped)
    jax.block_until_ready((init_logps, trans_lps))

    # module-shaped result (torch semantics) is just a broadcast view of the above
    _, trans_logps = transition_forward(uniqenc, seqlen, prepped, expand_seq=True)
    jax.block_until_ready(trans_logps)

    # sanity check against a pure-JAX reference (diagonal entries are -inf)
    init_ref, trans_ref = reference_forward(uniqenc, seqlen, raw_params)
    fin = jnp.isfinite(trans_ref)
    assert init_logps.shape == (bsz, Ktot)
    assert trans_lps.shape == (bsz, Ktot, Ktot)
    assert trans_logps.shape == (seqlen - 1, bsz, Ktot, Ktot)
    assert bool(jnp.all(jnp.isfinite(trans_logps) == fin))
    assert bool(jnp.allclose(jnp.where(fin, trans_logps, 0.0),
                             jnp.where(fin, trans_ref, 0.0),
                             rtol=1e-2, atol=1e-2))
    assert bool(jnp.allclose(init_logps, init_ref, rtol=1e-2, atol=1e-2))

    print("KERNEL_OK")
</pallas_src>

<mosaic_0001>
module attributes {stable_mosaic.version = 11 : i64} {
  func.func @kernel(%arg0: memref<2x32xf32, #tpu.memory_space<vmem>>, %arg1: memref<32x16xf32, #tpu.memory_space<vmem>>, %arg2: memref<1x16xf32, #tpu.memory_space<vmem>>, %arg3: memref<16x256xf32, #tpu.memory_space<vmem>>, %arg4: memref<1x256xf32, #tpu.memory_space<vmem>>, %arg5: memref<32x16xf32, #tpu.memory_space<vmem>>, %arg6: memref<1x16xf32, #tpu.memory_space<vmem>>, %arg7: memref<16x8xf32, #tpu.memory_space<vmem>>, %arg8: memref<8x16xf32, #tpu.memory_space<vmem>>, %arg9: memref<16x16xf32, #tpu.memory_space<vmem>>, %arg10: memref<2x16xf32, #tpu.memory_space<vmem>>, %arg11: memref<2x16x16xf32, #tpu.memory_space<vmem>>, %arg12: memref<2x256xf32, #tpu.memory_space<vmem>>, %arg13: memref<2x16x8xf32, #tpu.memory_space<vmem>>, %arg14: memref<2x8x16xf32, #tpu.memory_space<vmem>>) attributes {dimension_semantics = [], scalar_prefetch = 0 : i64, scratch_operands = 3 : i64, tpu.core_type = #tpu.core_type<tc>} {
    %c0 = arith.constant 0 : index
    %c0_0 = arith.constant 0 : index
    %0 = vector.load %arg0[%c0, %c0_0] : memref<2x32xf32, #tpu.memory_space<vmem>>, vector<2x32xf32>
    %c0_1 = arith.constant 0 : index
    %c0_2 = arith.constant 0 : index
    %1 = vector.load %arg5[%c0_1, %c0_2] : memref<32x16xf32, #tpu.memory_space<vmem>>, vector<32x16xf32>
    %cst = arith.constant dense<0.000000e+00> : vector<2x16xf32>
    %2 = tpu.matmul %0, %1, %cst {dimension_numbers = #tpu.dot_dimension_numbers<[1], [0], [0], [1], [0, 0, 1, 1], [], []>} : vector<2x32xf32>, vector<32x16xf32>, vector<2x16xf32> -> vector<2x16xf32>
    %c0_3 = arith.constant 0 : index
    %c0_4 = arith.constant 0 : index
    %3 = vector.load %arg6[%c0_3, %c0_4] : memref<1x16xf32, #tpu.memory_space<vmem>>, vector<1x16xf32>
    %4 = vector.broadcast %3 : vector<1x16xf32> to vector<2x16xf32>
    %5 = arith.addf %2, %4 : vector<2x16xf32>
    %cst_5 = arith.constant dense<0xFF800000> : vector<2xf32>
    %6 = vector.multi_reduction <maximumf>, %5, %cst_5 [1] : vector<2x16xf32> to vector<2xf32>
    %7 = vector.shape_cast %6 : vector<2xf32> to vector<2x1xf32>
    %8 = vector.broadcast %7 : vector<2x1xf32> to vector<2x16xf32>
    %9 = arith.subf %5, %8 : vector<2x16xf32>
    %10 = vector.broadcast %7 : vector<2x1xf32> to vector<2x16xf32>
    %11 = arith.subf %5, %10 : vector<2x16xf32>
    %12 = math.exp %11 : vector<2x16xf32>
    %cst_6 = arith.constant dense<0.000000e+00> : vector<2xf32>
    %13 = vector.multi_reduction <add>, %12, %cst_6 [1] : vector<2x16xf32> to vector<2xf32>
    %14 = vector.shape_cast %13 : vector<2xf32> to vector<2x1xf32>
    %15 = math.log %14 : vector<2x1xf32>
    %16 = vector.broadcast %15 : vector<2x1xf32> to vector<2x16xf32>
    %17 = arith.subf %9, %16 : vector<2x16xf32>
    %c0_7 = arith.constant 0 : index
    %c0_8 = arith.constant 0 : index
    %18 = vector.load %arg10[%c0_7, %c0_8] : memref<2x16xf32, #tpu.memory_space<vmem>>, vector<2x16xf32>
    tpu.vector_store %arg10[%c0_7, %c0_8], %17 {strides = array<i32>} : memref<2x16xf32, #tpu.memory_space<vmem>>, vector<2x16xf32>,
    %c0_9 = arith.constant 0 : index
    %c0_10 = arith.constant 0 : index
    %19 = vector.load %arg1[%c0_9, %c0_10] : memref<32x16xf32, #tpu.memory_space<vmem>>, vector<32x16xf32>
    %cst_11 = arith.constant dense<0.000000e+00> : vector<2x16xf32>
    %20 = tpu.matmul %0, %19, %cst_11 {dimension_numbers = #tpu.dot_dimension_numbers<[1], [0], [0], [1], [0, 0, 1, 1], [], []>} : vector<2x32xf32>, vector<32x16xf32>, vector<2x16xf32> -> vector<2x16xf32>
    %c0_12 = arith.constant 0 : index
    %c0_13 = arith.constant 0 : index
    %21 = vector.load %arg2[%c0_12, %c0_13] : memref<1x16xf32, #tpu.memory_space<vmem>>, vector<1x16xf32>
    %22 = vector.broadcast %21 : vector<1x16xf32> to vector<2x16xf32>
    %23 = arith.addf %20, %22 : vector<2x16xf32>
    %cst_14 = arith.constant 0.000000e+00 : f32
    %24 = vector.broadcast %cst_14 : f32 to vector<2x16xf32>
    %25 = arith.maximumf %23, %24 : vector<2x16xf32>
    %c0_15 = arith.constant 0 : index
    %c0_16 = arith.constant 0 : index
    %26 = vector.load %arg3[%c0_15, %c0_16] : memref<16x256xf32, #tpu.memory_space<vmem>>, vector<16x256xf32>
    %cst_17 = arith.constant dense<0.000000e+00> : vector<2x256xf32>
    %27 = tpu.matmul %25, %26, %cst_17 {dimension_numbers = #tpu.dot_dimension_numbers<[1], [0], [0], [1], [0, 0, 1, 1], [], []>} : vector<2x16xf32>, vector<16x256xf32>, vector<2x256xf32> -> vector<2x256xf32>
    %c0_18 = arith.constant 0 : index
    %c0_19 = arith.constant 0 : index
    %28 = vector.load %arg4[%c0_18, %c0_19] : memref<1x256xf32, #tpu.memory_space<vmem>>, vector<1x256xf32>
    %29 = vector.broadcast %28 : vector<1x256xf32> to vector<2x256xf32>
    %30 = arith.addf %27, %29 : vector<2x256xf32>
    %c0_20 = arith.constant 0 : index
    %c0_21 = arith.constant 0 : index
    %31 = vector.load %arg12[%c0_20, %c0_21] : memref<2x256xf32, #tpu.memory_space<vmem>>, vector<2x256xf32>
    tpu.vector_store %arg12[%c0_20, %c0_21], %30 {strides = array<i32>} : memref<2x256xf32, #tpu.memory_space<vmem>>, vector<2x256xf32>,
    %c0_22 = arith.constant 0 : index
    %c0_23 = arith.constant 0 : index
    %32 = vector.load %arg12[%c0_22, %c0_23] : memref<2x256xf32, #tpu.memory_space<vmem>>, vector<2x8xf32>
    %c0_24 = arith.constant 0 : index
    %c0_25 = arith.constant 0 : index
    %c0_26 = arith.constant 0 : index
    %33 = vector.load %arg13[%c0_24, %c0_25, %c0_26] : memref<2x16x8xf32, #tpu.memory_space<vmem>>, vector<2x1x8xf32>
    %34 = vector.shape_cast %33 : vector<2x1x8xf32> to vector<2x8xf32>
    %35 = vector.shape_cast %32 : vector<2x8xf32> to vector<2x1x8xf32>
    tpu.vector_store %arg13[%c0_24, %c0_25, %c0_26], %35 {strides = array<i32>} : memref<2x16x8xf32, #tpu.memory_space<vmem>>, vector<2x1x8xf32>,
    %c0_27 = arith.constant 0 : index
    %c8 = arith.constant 8 : index
    %36 = vector.load %arg12[%c0_27, %c8] : memref<2x256xf32, #tpu.memory_space<vmem>>, vector<2x8xf32>
    %c0_28 = arith.constant 0 : index
    %c1 = arith.constant 1 : index
    %c0_29 = arith.constant 0 : index
    %37 = vector.load %arg13[%c0_28, %c1, %c0_29] : memref<2x16x8xf32, #tpu.memory_space<vmem>>, vector<2x1x8xf32>
    %38 = vector.shape_cast %37 : vector<2x1x8xf32> to vector<2x8xf32>
    %39 = vector.shape_cast %36 : vector<2x8xf32> to vector<2x1x8xf32>
    tpu.vector_store %arg13[%c0_28, %c1, %c0_29], %39 {strides = array<i32>} : memref<2x16x8xf32, #tpu.memory_space<vmem>>, vector<2x1x8xf32>,
    %c0_30 = arith.constant 0 : index
    %c16 = arith.constant 16 : index
    %40 = vector.load %arg12[%c0_30, %c16] : memref<2x256xf32, #tpu.memory_space<vmem>>, vector<2x8xf32>
    %c0_31 = arith.constant 0 : index
    %c2 = arith.constant 2 : index
    %c0_32 = arith.constant 0 : index
    %41 = vector.load %arg13[%c0_31, %c2, %c0_32] : memref<2x16x8xf32, #tpu.memory_space<vmem>>, vector<2x1x8xf32>
    %42 = vector.shape_cast %41 : vector<2x1x8xf32> to vector<2x8xf32>
    %43 = vector.shape_cast %40 : vector<2x8xf32> to vector<2x1x8xf32>
    tpu.vector_store %arg13[%c0_31, %c2, %c0_32], %43 {strides = array<i32>} : memref<2x16x8xf32, #tpu.memory_space<vmem>>, vector<2x1x8xf32>,
    %c0_33 = arith.constant 0 : index
    %c24 = arith.constant 24 : index
    %44 = vector.load %arg12[%c0_33, %c24] : memref<2x256xf32, #tpu.memory_space<vmem>>, vector<2x8xf32>
    %c0_34 = arith.constant 0 : index
    %c3 = arith.constant 3 : index
    %c0_35 = arith.constant 0 : index
    %45 = vector.load %arg13[%c0_34, %c3, %c0_35] : memref<2x16x8xf32, #tpu.memory_space<vmem>>, vector<2x1x8xf32>
    %46 = vector.shape_cast %45 : vector<2x1x8xf32> to vector<2x8xf32>
    %47 = vector.shape_cast %44 : vector<2x8xf32> to vector<2x1x8xf32>
    tpu.vector_store %arg13[%c0_34, %c3, %c0_35], %47 {strides = array<i32>} : memref<2x16x8xf32, #tpu.memory_space<vmem>>, vector<2x1x8xf32>,
    %c0_36 = arith.constant 0 : index
    %c32 = arith.constant 32 : index
    %48 = vector.load %arg12[%c0_36, %c32] : memref<2x256xf32, #tpu.memory_space<vmem>>, vector<2x8xf32>
    %c0_37 = arith.constant 0 : index
    %c4 = arith.constant 4 : index
    %c0_38 = arith.constant 0 : index
    %49 = vector.load %arg13[%c0_37, %c4, %c0_38] : memref<2x16x8xf32, #tpu.memory_space<vmem>>, vector<2x1x8xf32>
    %50 = vector.shape_cast %49 : vector<2x1x8xf32> to vector<2x8xf32>
    %51 = vector.shape_cast %48 : vector<2x8xf32> to vector<2x1x8xf32>
    tpu.vector_store %arg13[%c0_37, %c4, %c0_38], %51 {strides = array<i32>} : memref<2x16x8xf32, #tpu.memory_space<vmem>>, vector<2x1x8xf32>,
    %c0_39 = arith.constant 0 : index
    %c40 = arith.constant 40 : index
    %52 = vector.load %arg12[%c0_39, %c40] : memref<2x256xf32, #tpu.memory_space<vmem>>, vector<2x8xf32>
    %c0_40 = arith.constant 0 : index
    %c5 = arith.constant 5 : index
    %c0_41 = arith.constant 0 : index
    %53 = vector.load %arg13[%c0_40, %c5, %c0_41] : memref<2x16x8xf32, #tpu.memory_space<vmem>>, vector<2x1x8xf32>
    %54 = vector.shape_cast %53 : vector<2x1x8xf32> to vector<2x8xf32>
    %55 = vector.shape_cast %52 : vector<2x8xf32> to vector<2x1x8xf32>
    tpu.vector_store %arg13[%c0_40, %c5, %c0_41], %55 {strides = array<i32>} : memref<2x16x8xf32, #tpu.memory_space<vmem>>, vector<2x1x8xf32>,
    %c0_42 = arith.constant 0 : index
    %c48 = arith.constant 48 : index
    %56 = vector.load %arg12[%c0_42, %c48] : memref<2x256xf32, #tpu.memory_space<vmem>>, vector<2x8xf32>
    %c0_43 = arith.constant 0 : index
    %c6 = arith.constant 6 : index
    %c0_44 = arith.constant 0 : index
    %57 = vector.load %arg13[%c0_43, %c6, %c0_44] : memref<2x16x8xf32, #tpu.memory_space<vmem>>, vector<2x1x8xf32>
    %58 = vector.shape_cast %57 : vector<2x1x8xf32> to vector<2x8xf32>
    %59 = vector.shape_cast %56 : vector<2x8xf32> to vector<2x1x8xf32>
    tpu.vector_store %arg13[%c0_43, %c6, %c0_44], %59 {strides = array<i32>} : memref<2x16x8xf32, #tpu.memory_space<vmem>>, vector<2x1x8xf32>,
    %c0_45 = arith.constant 0 : index
    %c56 = arith.constant 56 : index
    %60 = vector.load %arg12[%c0_45, %c56] : memref<2x256xf32, #tpu.memory_space<vmem>>, vector<2x8xf32>
    %c0_46 = arith.constant 0 : index
    %c7 = arith.constant 7 : index
    %c0_47 = arith.constant 0 : index
    %61 = vector.load %arg13[%c0_46, %c7, %c0_47] : memref<2x16x8xf32, #tpu.memory_space<vmem>>, vector<2x1x8xf32>
    %62 = vector.shape_cast %61 : vector<2x1x8xf32> to vector<2x8xf32>
    %63 = vector.shape_cast %60 : vector<2x8xf32> to vector<2x1x8xf32>
    tpu.vector_store %arg13[%c0_46, %c7, %c0_47], %63 {strides = array<i32>} : memref<2x16x8xf32, #tpu.memory_space<vmem>>, vector<2x1x8xf32>,
    %c0_48 = arith.constant 0 : index
    %c64 = arith.constant 64 : index
    %64 = vector.load %arg12[%c0_48, %c64] : memref<2x256xf32, #tpu.memory_space<vmem>>, vector<2x8xf32>
    %c0_49 = arith.constant 0 : index
    %c8_50 = arith.constant 8 : index
    %c0_51 = arith.constant 0 : index
    %65 = vector.load %arg13[%c0_49, %c8_50, %c0_51] : memref<2x16x8xf32, #tpu.memory_space<vmem>>, vector<2x1x8xf32>
    %66 = vector.shape_cast %65 : vector<2x1x8xf32> to vector<2x8xf32>
    %67 = vector.shape_cast %64 : vector<2x8xf32> to vector<2x1x8xf32>
    tpu.vector_store %arg13[%c0_49, %c8_50, %c0_51], %67 {strides = array<i32>} : memref<2x16x8xf32, #tpu.memory_space<vmem>>, vector<2x1x8xf32>,
    %c0_52 = arith.constant 0 : index
    %c72 = arith.constant 72 : index
    %68 = vector.load %arg12[%c0_52, %c72] : memref<2x256xf32, #tpu.memory_space<vmem>>, vector<2x8xf32>
    %c0_53 = arith.constant 0 : index
    %c9 = arith.constant 9 : index
    %c0_54 = arith.constant 0 : index
    %69 = vector.load %arg13[%c0_53, %c9, %c0_54] : memref<2x16x8xf32, #tpu.memory_space<vmem>>, vector<2x1x8xf32>
    %70 = vector.shape_cast %69 : vector<2x1x8xf32> to vector<2x8xf32>
    %71 = vector.shape_cast %68 : vector<2x8xf32> to vector<2x1x8xf32>
    tpu.vector_store %arg13[%c0_53, %c9, %c0_54], %71 {strides = array<i32>} : memref<2x16x8xf32, #tpu.memory_space<vmem>>, vector<2x1x8xf32>,
    %c0_55 = arith.constant 0 : index
    %c80 = arith.constant 80 : index
    %72 = vector.load %arg12[%c0_55, %c80] : memref<2x256xf32, #tpu.memory_space<vmem>>, vector<2x8xf32>
    %c0_56 = arith.constant 0 : index
    %c10 = arith.constant 10 : index
    %c0_57 = arith.constant 0 : index
    %73 = vector.load %arg13[%c0_56, %c10, %c0_57] : memref<2x16x8xf32, #tpu.memory_space<vmem>>, vector<2x1x8xf32>
    %74 = vector.shape_cast %73 : vector<2x1x8xf32> to vector<2x8xf32>
    %75 = vector.shape_cast %72 : vector<2x8xf32> to vector<2x1x8xf32>
    tpu.vector_store %arg13[%c0_56, %c10, %c0_57], %75 {strides = array<i32>} : memref<2x16x8xf32, #tpu.memory_space<vmem>>, vector<2x1x8xf32>,
    %c0_58 = arith.constant 0 : index
    %c88 = arith.constant 88 : index
    %76 = vector.load %arg12[%c0_58, %c88] : memref<2x256xf32, #tpu.memory_space<vmem>>, vector<2x8xf32>
    %c0_59 = arith.constant 0 : index
    %c11 = arith.constant 11 : index
    %c0_60 = arith.constant 0 : index
    %77 = vector.load %arg13[%c0_59, %c11, %c0_60] : memref<2x16x8xf32, #tpu.memory_space<vmem>>, vector<2x1x8xf32>
    %78 = vector.shape_cast %77 : vector<2x1x8xf32> to vector<2x8xf32>
    %79 = vector.shape_cast %76 : vector<2x8xf32> to vector<2x1x8xf32>
    tpu.vector_store %arg13[%c0_59, %c11, %c0_60], %79 {strides = array<i32>} : memref<2x16x8xf32, #tpu.memory_space<vmem>>, vector<2x1x8xf32>,
    %c0_61 = arith.constant 0 : index
    %c96 = arith.constant 96 : index
    %80 = vector.load %arg12[%c0_61, %c96] : memref<2x256xf32, #tpu.memory_space<vmem>>, vector<2x8xf32>
    %c0_62 = arith.constant 0 : index
    %c12 = arith.constant 12 : index
    %c0_63 = arith.constant 0 : index
    %81 = vector.load %arg13[%c0_62, %c12, %c0_63] : memref<2x16x8xf32, #tpu.memory_space<vmem>>, vector<2x1x8xf32>
    %82 = vector.shape_cast %81 : vector<2x1x8xf32> to vector<2x8xf32>
    %83 = vector.shape_cast %80 : vector<2x8xf32> to vector<2x1x8xf32>
    tpu.vector_store %arg13[%c0_62, %c12, %c0_63], %83 {strides = array<i32>} : memref<2x16x8xf32, #tpu.memory_space<vmem>>, vector<2x1x8xf32>,
    %c0_64 = arith.constant 0 : index
    %c104 = arith.constant 104 : index
    %84 = vector.load %arg12[%c0_64, %c104] : memref<2x256xf32, #tpu.memory_space<vmem>>, vector<2x8xf32>
    %c0_65 = arith.constant 0 : index
    %c13 = arith.constant 13 : index
    %c0_66 = arith.constant 0 : index
    %85 = vector.load %arg13[%c0_65, %c13, %c0_66] : memref<2x16x8xf32, #tpu.memory_space<vmem>>, vector<2x1x8xf32>
    %86 = vector.shape_cast %85 : vector<2x1x8xf32> to vector<2x8xf32>
    %87 = vector.shape_cast %84 : vector<2x8xf32> to vector<2x1x8xf32>
    tpu.vector_store %arg13[%c0_65, %c13, %c0_66], %87 {strides = array<i32>} : memref<2x16x8xf32, #tpu.memory_space<vmem>>, vector<2x1x8xf32>,
    %c0_67 = arith.constant 0 : index
    %c112 = arith.constant 112 : index
    %88 = vector.load %arg12[%c0_67, %c112] : memref<2x256xf32, #tpu.memory_space<vmem>>, vector<2x8xf32>
    %c0_68 = arith.constant 0 : index
    %c14 = arith.constant 14 : index
    %c0_69 = arith.constant 0 : index
    %89 = vector.load %arg13[%c0_68, %c14, %c0_69] : memref<2x16x8xf32, #tpu.memory_space<vmem>>, vector<2x1x8xf32>
    %90 = vector.shape_cast %89 : vector<2x1x8xf32> to vector<2x8xf32>
    %91 = vector.shape_cast %88 : vector<2x8xf32> to vector<2x1x8xf32>
    tpu.vector_store %arg13[%c0_68, %c14, %c0_69], %91 {strides = array<i32>} : memref<2x16x8xf32, #tpu.memory_space<vmem>>, vector<2x1x8xf32>,
    %c0_70 = arith.constant 0 : index
    %c120 = arith.constant 120 : index
    %92 = vector.load %arg12[%c0_70, %c120] : memref<2x256xf32, #tpu.memory_space<vmem>>, vector<2x8xf32>
    %c0_71 = arith.constant 0 : index
    %c15 = arith.constant 15 : index
    %c0_72 = arith.constant 0 : index
    %93 = vector.load %arg13[%c0_71, %c15, %c0_72] : memref<2x16x8xf32, #tpu.memory_space<vmem>>, vector<2x1x8xf32>
    %94 = vector.shape_cast %93 : vector<2x1x8xf32> to vector<2x8xf32>
    %95 = vector.shape_cast %92 : vector<2x8xf32> to vector<2x1x8xf32>
    tpu.vector_store %arg13[%c0_71, %c15, %c0_72], %95 {strides = array<i32>} : memref<2x16x8xf32, #tpu.memory_space<vmem>>, vector<2x1x8xf32>,
    %c0_73 = arith.constant 0 : index
    %c128 = arith.constant 128 : index
    %96 = vector.load %arg12[%c0_73, %c128] : memref<2x256xf32, #tpu.memory_space<vmem>>, vector<2x16xf32>
    %c0_74 = arith.constant 0 : index
    %c0_75 = arith.constant 0 : index
    %c0_76 = arith.constant 0 : index
    %97 = vector.load %arg14[%c0_74, %c0_75, %c0_76] : memref<2x8x16xf32, #tpu.memory_space<vmem>>, vector<2x1x16xf32>
    %98 = vector.shape_cast %97 : vector<2x1x16xf32> to vector<2x16xf32>
    %99 = vector.shape_cast %96 : vector<2x16xf32> to vector<2x1x16xf32>
    tpu.vector_store %arg14[%c0_74, %c0_75, %c0_76], %99 {strides = array<i32>} : memref<2x8x16xf32, #tpu.memory_space<vmem>>, vector<2x1x16xf32>,
    %c0_77 = arith.constant 0 : index
    %c144 = arith.constant 144 : index
    %100 = vector.load %arg12[%c0_77, %c144] : memref<2x256xf32, #tpu.memory_space<vmem>>, vector<2x16xf32>
    %c0_78 = arith.constant 0 : index
    %c1_79 = arith.constant 1 : index
    %c0_80 = arith.constant 0 : index
    %101 = vector.load %arg14[%c0_78, %c1_79, %c0_80] : memref<2x8x16xf32, #tpu.memory_space<vmem>>, vector<2x1x16xf32>
    %102 = vector.shape_cast %101 : vector<2x1x16xf32> to vector<2x16xf32>
    %103 = vector.shape_cast %100 : vector<2x16xf32> to vector<2x1x16xf32>
    tpu.vector_store %arg14[%c0_78, %c1_79, %c0_80], %103 {strides = array<i32>} : memref<2x8x16xf32, #tpu.memory_space<vmem>>, vector<2x1x16xf32>,
    %c0_81 = arith.constant 0 : index
    %c160 = arith.constant 160 : index
    %104 = vector.load %arg12[%c0_81, %c160] : memref<2x256xf32, #tpu.memory_space<vmem>>, vector<2x16xf32>
    %c0_82 = arith.constant 0 : index
    %c2_83 = arith.constant 2 : index
    %c0_84 = arith.constant 0 : index
    %105 = vector.load %arg14[%c0_82, %c2_83, %c0_84] : memref<2x8x16xf32, #tpu.memory_space<vmem>>, vector<2x1x16xf32>
    %106 = vector.shape_cast %105 : vector<2x1x16xf32> to vector<2x16xf32>
    %107 = vector.shape_cast %104 : vector<2x16xf32> to vector<2x1x16xf32>
    tpu.vector_store %arg14[%c0_82, %c2_83, %c0_84], %107 {strides = array<i32>} : memref<2x8x16xf32, #tpu.memory_space<vmem>>, vector<2x1x16xf32>,
    %c0_85 = arith.constant 0 : index
    %c176 = arith.constant 176 : index
    %108 = vector.load %arg12[%c0_85, %c176] : memref<2x256xf32, #tpu.memory_space<vmem>>, vector<2x16xf32>
    %c0_86 = arith.constant 0 : index
    %c3_87 = arith.constant 3 : index
    %c0_88 = arith.constant 0 : index
    %109 = vector.load %arg14[%c0_86, %c3_87, %c0_88] : memref<2x8x16xf32, #tpu.memory_space<vmem>>, vector<2x1x16xf32>
    %110 = vector.shape_cast %109 : vector<2x1x16xf32> to vector<2x16xf32>
    %111 = vector.shape_cast %108 : vector<2x16xf32> to vector<2x1x16xf32>
    tpu.vector_store %arg14[%c0_86, %c3_87, %c0_88], %111 {strides = array<i32>} : memref<2x8x16xf32, #tpu.memory_space<vmem>>, vector<2x1x16xf32>,
    %c0_89 = arith.constant 0 : index
    %c192 = arith.constant 192 : index
    %112 = vector.load %arg12[%c0_89, %c192] : memref<2x256xf32, #tpu.memory_space<vmem>>, vector<2x16xf32>
    %c0_90 = arith.constant 0 : index
    %c4_91 = arith.constant 4 : index
    %c0_92 = arith.constant 0 : index
    %113 = vector.load %arg14[%c0_90, %c4_91, %c0_92] : memref<2x8x16xf32, #tpu.memory_space<vmem>>, vector<2x1x16xf32>
    %114 = vector.shape_cast %113 : vector<2x1x16xf32> to vector<2x16xf32>
    %115 = vector.shape_cast %112 : vector<2x16xf32> to vector<2x1x16xf32>
    tpu.vector_store %arg14[%c0_90, %c4_91, %c0_92], %115 {strides = array<i32>} : memref<2x8x16xf32, #tpu.memory_space<vmem>>, vector<2x1x16xf32>,
    %c0_93 = arith.constant 0 : index
    %c208 = arith.constant 208 : index
    %116 = vector.load %arg12[%c0_93, %c208] : memref<2x256xf32, #tpu.memory_space<vmem>>, vector<2x16xf32>
    %c0_94 = arith.constant 0 : index
    %c5_95 = arith.constant 5 : index
    %c0_96 = arith.constant 0 : index
    %117 = vector.load %arg14[%c0_94, %c5_95, %c0_96] : memref<2x8x16xf32, #tpu.memory_space<vmem>>, vector<2x1x16xf32>
    %118 = vector.shape_cast %117 : vector<2x1x16xf32> to vector<2x16xf32>
    %119 = vector.shape_cast %116 : vector<2x16xf32> to vector<2x1x16xf32>
    tpu.vector_store %arg14[%c0_94, %c5_95, %c0_96], %119 {strides = array<i32>} : memref<2x8x16xf32, #tpu.memory_space<vmem>>, vector<2x1x16xf32>,
    %c0_97 = arith.constant 0 : index
    %c224 = arith.constant 224 : index
    %120 = vector.load %arg12[%c0_97, %c224] : memref<2x256xf32, #tpu.memory_space<vmem>>, vector<2x16xf32>
    %c0_98 = arith.constant 0 : index
    %c6_99 = arith.constant 6 : index
    %c0_100 = arith.constant 0 : index
    %121 = vector.load %arg14[%c0_98, %c6_99, %c0_100] : memref<2x8x16xf32, #tpu.memory_space<vmem>>, vector<2x1x16xf32>
    %122 = vector.shape_cast %121 : vector<2x1x16xf32> to vector<2x16xf32>
    %123 = vector.shape_cast %120 : vector<2x16xf32> to vector<2x1x16xf32>
    tpu.vector_store %arg14[%c0_98, %c6_99, %c0_100], %123 {strides = array<i32>} : memref<2x8x16xf32, #tpu.memory_space<vmem>>, vector<2x1x16xf32>,
    %c0_101 = arith.constant 0 : index
    %c240 = arith.constant 240 : index
    %124 = vector.load %arg12[%c0_101, %c240] : memref<2x256xf32, #tpu.memory_space<vmem>>, vector<2x16xf32>
    %c0_102 = arith.constant 0 : index
    %c7_103 = arith.constant 7 : index
    %c0_104 = arith.constant 0 : index
    %125 = vector.load %arg14[%c0_102, %c7_103, %c0_104] : memref<2x8x16xf32, #tpu.memory_space<vmem>>, vector<2x1x16xf32>
    %126 = vector.shape_cast %125 : vector<2x1x16xf32> to vector<2x16xf32>
    %127 = vector.shape_cast %124 : vector<2x16xf32> to vector<2x1x16xf32>
    tpu.vector_store %arg14[%c0_102, %c7_103, %c0_104], %127 {strides = array<i32>} : memref<2x8x16xf32, #tpu.memory_space<vmem>>, vector<2x1x16xf32>,
    %c0_105 = arith.constant 0 : index
    %c0_106 = arith.constant 0 : index
    %128 = vector.load %arg7[%c0_105, %c0_106] : memref<16x8xf32, #tpu.memory_space<vmem>>, vector<16x8xf32>
    %c0_107 = arith.constant 0 : index
    %c0_108 = arith.constant 0 : index
    %129 = vector.load %arg8[%c0_107, %c0_108] : memref<8x16xf32, #tpu.memory_space<vmem>>, vector<8x16xf32>
    %cst_109 = arith.constant dense<0.000000e+00> : vector<16x16xf32>
    %130 = tpu.matmul %128, %129, %cst_109 {dimension_numbers = #tpu.dot_dimension_numbers<[1], [0], [0], [1], [0, 0, 1, 1], [], []>} : vector<16x8xf32>, vector<8x16xf32>, vector<16x16xf32> -> vector<16x16xf32>
    %c0_110 = arith.constant 0 : index
    %c0_111 = arith.constant 0 : index
    %131 = vector.load %arg9[%c0_110, %c0_111] : memref<16x16xf32, #tpu.memory_space<vmem>>, vector<16x16xf32>
    %132 = arith.addf %130, %131 : vector<16x16xf32>
    %c0_112 = arith.constant 0 : index
    %c0_113 = arith.constant 0 : index
    %c0_114 = arith.constant 0 : index
    %133 = vector.load %arg13[%c0_112, %c0_113, %c0_114] : memref<2x16x8xf32, #tpu.memory_space<vmem>>, vector<2x16x8xf32>
    %c0_115 = arith.constant 0 : index
    %c0_116 = arith.constant 0 : index
    %c0_117 = arith.constant 0 : index
    %134 = vector.load %arg14[%c0_115, %c0_116, %c0_117] : memref<2x8x16xf32, #tpu.memory_space<vmem>>, vector<2x8x16xf32>
    %cst_118 = arith.constant dense<0.000000e+00> : vector<2x16x16xf32>
    %135 = tpu.matmul %133, %134, %cst_118 {dimension_numbers = #tpu.dot_dimension_numbers<[2], [1], [1], [2], [0, 0, 0, 1, 1, 2], [0], [0]>} : vector<2x16x8xf32>, vector<2x8x16xf32>, vector<2x16x16xf32> -> vector<2x16x16xf32>
    %136 = vector.shape_cast %132 : vector<16x16xf32> to vector<1x16x16xf32>
    %137 = vector.broadcast %136 : vector<1x16x16xf32> to vector<2x16x16xf32>
    %138 = arith.addf %137, %135 : vector<2x16x16xf32>
    %cst_119 = arith.constant dense<0xFF800000> : vector<2x16xf32>
    %139 = vector.multi_reduction <maximumf>, %138, %cst_119 [2] : vector<2x16x16xf32> to vector<2x16xf32>
    %140 = vector.shape_cast %139 : vector<2x16xf32> to vector<2x16x1xf32>
    %141 = vector.broadcast %140 : vector<2x16x1xf32> to vector<2x16x16xf32>
    %142 = arith.subf %138, %141 : vector<2x16x16xf32>
    %143 = vector.broadcast %140 : vector<2x16x1xf32> to vector<2x16x16xf32>
    %144 = arith.subf %138, %143 : vector<2x16x16xf32>
    %145 = math.exp %144 : vector<2x16x16xf32>
    %cst_120 = arith.constant dense<0.000000e+00> : vector<2x16xf32>
    %146 = vector.multi_reduction <add>, %145, %cst_120 [2] : vector<2x16x16xf32> to vector<2x16xf32>
    %147 = vector.shape_cast %146 : vector<2x16xf32> to vector<2x16x1xf32>
    %148 = math.log %147 : vector<2x16x1xf32>
    %149 = vector.broadcast %148 : vector<2x16x1xf32> to vector<2x16x16xf32>
    %150 = arith.subf %142, %149 : vector<2x16x16xf32>
    %c0_121 = arith.constant 0 : index
    %c0_122 = arith.constant 0 : index
    %c0_123 = arith.constant 0 : index
    %151 = vector.load %arg11[%c0_121, %c0_122, %c0_123] : memref<2x16x16xf32, #tpu.memory_space<vmem>>, vector<2x16x16xf32>
    tpu.vector_store %arg11[%c0_121, %c0_122, %c0_123], %150 {strides = array<i32>} : memref<2x16x16xf32, #tpu.memory_space<vmem>>, vector<2x16x16xf32>,
    return
  }
}

</mosaic_0001>

<bundles_post_ra>
// kernel: tpu_custom_call.1
= control target key start
LH: loop header
LB: loop body
LE: loop exit
PB: predicated region body
PF: predicated region fallthrough
CT: control target
= control target key end

     0   :  { %17 = vsyncpa [#allocation6], 0  ;;  %s1845_s0 = inlined_call_operand.vmem [shape: f32[2,32], index: 0, kind: input, shape index: {}]   ;;  %s1846_s1 = inlined_call_operand.vmem [shape: f32[32,16], index: 1, kind: input, shape index: {}]   ;;  %s1847_s2 = inlined_call_operand.vmem [shape: f32[1,16], index: 2, kind: input, shape index: {}]   ;;  %s1848_s3 = inlined_call_operand.vmem [shape: f32[16,256], index: 3, kind: input, shape index: {}]   ;;  %s1849_s4 = inlined_call_operand.vmem [shape: f32[1,256], index: 4, kind: input, shape index: {}]   ;;  %s1850_s5 = inlined_call_operand.vmem [shape: f32[32,16], index: 5, kind: input, shape index: {}]   ;;  %s1851_s6 = inlined_call_operand.vmem [shape: f32[1,16], index: 6, kind: input, shape index: {}]   ;;  %s1852_s7 = inlined_call_operand.vmem [shape: f32[16,8], index: 7, kind: input, shape index: {}]   ;;  %s1853_s8 = inlined_call_operand.vmem [shape: f32[8,16], index: 8, kind: input, shape index: {}]   ;;  %s1854_s9 = inlined_call_operand.vmem [shape: f32[16,16], index: 9, kind: input, shape index: {}]   ;;  %s1855_s10 = inlined_call_operand.hbm [shape: f32[2,16], index: 10, kind: output, shape index: {0}]   ;;  %s1856_s11 = inlined_call_operand.hbm [shape: f32[2,16,16], index: 11, kind: output, shape index: {1}]  }
   0x1   :  { %v43_v0 = vld [vmem:[%s1850_s5 + $0x18] sm:$0xff]  ;;  %v42_v1 = vld [vmem:[%s1850_s5 + $0x10] sm:$0xff]  ;;  %v41_v2 = vld [vmem:[%s1850_s5 + $0x8] sm:$0xff] }
   0x2   :  { %64 = vmatpush.msra.mxu1 %v43_v0  ;;  %v40_v3 = vld [vmem:[%s1850_s5] sm:$0xff] }
   0x4   :  { %65 = vmatpush.msra.mxu1 %v42_v1 }
   0x5   :  { %18 = vsyncpa [#allocation8], 0  ;;  %v39_v4 = vld [vmem:[%s1845_s0] sm:$0x3]  ;;  %vm48_vm0 = vcmask 261120   ;;  %v89_v5 = vld [vmem:[%s1846_s1 + $0x18] sm:$0xff] }
   0x6   :  { %66 = vmatpush.msra.mxu1 %v41_v2  ;;  %v88_v6 = vld [vmem:[%s1846_s1 + $0x10] sm:$0xff]  ;;  %v87_v7 = vld [vmem:[%s1846_s1 + $0x8] sm:$0xff]  ;;  %v86_v8 = vld [vmem:[%s1846_s1] sm:$0xff]  ;;  %vm125_vm1 = vcmask 130048   ;;  %vm172_vm2 = vcmask 1041408   ;;  %vm181_vm3 = vcmask 1040384  }
   0x7   :  { %v117_v9 = vld [vmem:[%s1848_s3 + $0x10] sm:$0xff]  ;;  %v118_v10 = vld [vmem:[%s1848_s3 + $0x18] sm:$0xff]  ;;  %v115_v11 = vld [vmem:[%s1848_s3] sm:$0xff]  ;;  %vm183_vm4 = vcmask 1042434   ;;  %s994_s25 = smov 32   ;;  %s995_s26 = smov 64  }
   0x8   :  { %67 = vmatpush.msra.mxu1 %v40_v3  ;;  %143 = vmatpush.msra.mxu2 %v117_v9  ;;  %v116_v12 = vld [vmem:[%s1848_s3 + $0x8] sm:$0xff]  ;;  %v918_v14 = vld [vmem:[%s1847_s2] ss:$0 sm:$0xff]  ;;  %s991_s2 = smov 48   ;;  %s992_s3 = smov 80   ;;  %vm186_vm5 = vcmask 1041409  }
   0x9   :  { %888 = vmatmul.msk.f32.vlgmr.msra.gmra.mxu1 %vm48_vm0, %v39_v4  ;;  %163 = vmatpush.msra.mxu3 %v118_v10  ;;  %v119_v18 = vld [vmem:[%s1849_s4] sm:$0x3]  ;;  %s993_s4 = smov 112   ;;  %s996_s27 = smov 96   ;;  %vm188_vm6 = vcmask 1043459   ;;  %vm190_vm7 = vcmask 1042433  }
   0xa   :  { %106 = vmatpush.msrb.mxu1 %v89_v5  ;;  %144 = vmatpush.msra.mxu2 %v115_v11  ;;  %v122_v19 = vperm.slane %v119_v18, 1  ;;  %v121_v20 = vperm.slane %v119_v18, 0  ;;  %s997_s28 = smov 120   ;;  %s998_s29 = smov 16   ;;  %vm542_vm8 = vcmask 122880   ;;  %vm195_vm9 = vcmask 57344  }
   0xb   :  { %164 = vmatpush.msra.mxu3 %v116_v12  ;;  %s999_s30 = smov 88   ;;  %s1000_s12 = smov 104   ;;  %vm704_vm10 = vcmask 64512   ;;  %vm72_vm11 = vcmask 123904  }
   0xc   :  { %107 = vmatpush.msrb.mxu1 %v88_v6  ;;  %s1001_s5 = smov 56   ;;  %s1002_s13 = smov 72  }
   0xd   :  { %s1003_s14 = smov 8   ;;  %s1004_s0 = smov 40  }
   0xe   :  { %108 = vmatpush.msrb.mxu1 %v87_v7  ;;  %s1005_s15 = smov 24  }
  0x10   :  { %109 = vmatpush.msrb.mxu1 %v86_v8 }
  0x11   :  { %889 = vmatmul.msk.f32.vlgmr.msrb.gmra.mxu1 %vm48_vm0, %v39_v4 }
  0x86   :  { %v1108_v13 = vpop.f32.mrf.mxu1 }
  0x8e   :  { %v111_v15 = vpop.f32.mrf.mxu1 }
  0x8f   :  { %v112_v16 = vadd.f32 %v918_v14, %v111_v15 }
  0x91   :  { %v114_v17 = vmax.f32 %v112_v16, 0.0 }
  0x93   :  { %890 = vmatmul.msk.f32.vlgmr.msra.gmra.mxu2 %vm125_vm1, %v114_v17  ;;  %891 = vmatmul.msk.f32.vlgmr.msra.gmra.mxu3 %vm125_vm1, %v114_v17 }
 0x116   :  { %v146_v21 = vpop.f32.mrf.mxu2  ;;  %v166_v22 = vpop.f32.mrf.mxu3 }
 0x117   :  { %v167_v23 = vadd.f32 %v166_v22, %v122_v19  ;;  %v147_v24 = vadd.f32 %v146_v21, %v121_v20 }
 0x119   :  { %v171_v25 = vrot.slane %v167_v23, 6 }
 0x11b   :  { %v173_v26 = vsel %vm172_vm2, %v147_v24, %v171_v25 }
 0x11c   :  { %175 = vst [vmem:[#allocation2] sm:$0xf] %v173_v26 }
 0x123   :  { %v1119_v27 = vld [vmem:[#allocation2 + $0x2] sm:$0x3]  ;;  %v1197_v4 = vld [vmem:[#allocation2] sm:$0x3] }
 0x124   :  { %v635_v28 = vrot.slane %v1119_v27, 1  ;;  %v636_v29 = vrot.slane %v1119_v27, 2  ;;  %v637_v30 = vrot.slane %v1119_v27, 3  ;;  %v1124_v31 = vld [vmem:[#allocation2 + $0x2] sm:$0x3]  ;;  %v222_v14 = vrot.slane %v1197_v4, 1 }
 0x125   :  { %v591_v32 = vrot.slane %v1124_v31, 1  ;;  %v592_v33 = vrot.slane %v1124_v31, 2  ;;  %v593_v34 = vrot.slane %v1124_v31, 3  ;;  %v1129_v35 = vld [vmem:[#allocation2 + $0x2] sm:$0x3]  ;;  %v223_v17 = vrot.slane %v1197_v4, 2 }
 0x126   :  { %v638_v36 = vsel %vm181_vm3, %v1119_v27, %v635_v28  ;;  %v639_v37 = vsel %vm183_vm4, %v636_v29, %v637_v30  ;;  %v547_v38 = vrot.slane %v1129_v35, 1  ;;  %v548_v39 = vrot.slane %v1129_v35, 2  ;;  %v1142_v40 = vld [vmem:[#allocation2 + $0x2] sm:$0x3]  ;;  %v1215_v9 = vld [vmem:[#allocation2] sm:$0x3] }
 0x127   :  { %v640_v41 = vsel %vm172_vm2, %v638_v36, %v639_v37  ;;  %v594_v42 = vsel %vm181_vm3, %v1124_v31, %v591_v32  ;;  %v595_v43 = vsel %vm183_vm4, %v592_v33, %v593_v34  ;;  %v549_v44 = vrot.slane %v1129_v35, 3  ;;  %v1155_v45 = vld [vmem:[#allocation2 + $0x2] sm:$0x3]  ;;  %v1242_v36 = vld [vmem:[#allocation2] sm:$0x3] }
 0x128   :  { %v645_v46 = vperm.slane %v640_v41, 0  ;;  %v596_v47 = vsel %vm172_vm2, %v594_v42, %v595_v43  ;;  %v550_v48 = vsel %vm181_vm3, %v1129_v35, %v547_v38  ;;  %v657_v49 = vrot.slane %v1142_v40, 1  ;;  %v1163_v50 = vld [vmem:[#allocation2 + $0x2] sm:$0x3]  ;;  %v1258_v43 = vld [vmem:[#allocation2] sm:$0x3] }
 0x129   :  { %v601_v51 = vperm.slane %v596_v47, 0  ;;  %v551_v52 = vsel %vm183_vm4, %v548_v39, %v549_v44  ;;  %v658_v53 = vrot.slane %v1142_v40, 2  ;;  %v659_v54 = vrot.slane %v1142_v40, 3  ;;  %v1195_v3 = vld [vmem:[#allocation2 + $0x2] sm:$0x3] }
 0x12a   :  { %647 = vrot.lane.b32.xlu2 %v645_v46, %s991_s2  ;;  %v552_v55 = vsel %vm172_vm2, %v550_v48, %v551_v52  ;;  %v660_v56 = vsel %vm181_vm3, %v1142_v40, %v657_v49  ;;  %v613_v57 = vrot.slane %v1155_v45, 1  ;;  %v614_v58 = vrot.slane %v1155_v45, 2  ;;  %v1262_v47 = vld [vmem:[#allocation2] sm:$0x3] }
 0x12b   :  { %603 = vrot.lane.b32.xlu1 %v601_v51, %s992_s3  ;;  %v557_v59 = vperm.slane %v552_v55, 0  ;;  %v661_v60 = vsel %vm183_vm4, %v658_v53, %v659_v54  ;;  %v615_v61 = vrot.slane %v1155_v45, 3  ;;  %v569_v62 = vrot.slane %v1163_v50, 1 }
 0x12c   :  { %v662_v63 = vsel %vm172_vm2, %v660_v56, %v661_v60  ;;  %v616_v0 = vsel %vm181_vm3, %v1155_v45, %v613_v57  ;;  %v570_v1 = vrot.slane %v1163_v50, 2  ;;  %v571_v2 = vrot.slane %v1163_v50, 3 }
 0x12d   :  { %559 = vrot.lane.b32.xlu0 %v557_v59, %s993_s4  ;;  %v617_v5 = vsel %vm183_vm4, %v614_v58, %v615_v61  ;;  %v572_v6 = vsel %vm181_vm3, %v1163_v50, %v569_v62  ;;  %v667_v10 = vperm.slane %v662_v63, 0  ;;  %v1874_v11 = vrot.slane %v1195_v3, 1 }
 0x12e   :  { %v618_v7 = vsel %vm172_vm2, %v616_v0, %v617_v5  ;;  %v573_v8 = vsel %vm183_vm4, %v570_v1, %v571_v2  ;;  %v1870_v12 = vrot.slane %v1195_v3, 2  ;;  %v1873_v16 = vrot.slane %v1195_v3, 3 }
 0x12f   :  { %v574_v15 = vsel %vm172_vm2, %v572_v6, %v573_v8  ;;  %v224_v18 = vrot.slane %v1197_v4, 3  ;;  %v623_v19 = vperm.slane %v618_v7, 0  ;;  %v1869_v20 = vrot.slane %v1215_v9, 1 }
 0x130   :  { %v1863_v21 = vrot.slane %v1215_v9, 2  ;;  %v225_v22 = vsel %vm181_vm3, %v1197_v4, %v222_v14  ;;  %v1865_v24 = vrot.slane %v1215_v9, 3  ;;  %v579_v25 = vperm.slane %v574_v15, 0 }
 0x131   :  { %v226_v23 = vsel %vm183_vm4, %v223_v17, %v224_v18  ;;  %v203_v26 = vsel %vm181_vm3, %v1215_v9, %v1869_v20  ;;  %v682_v37 = vsel %vm181_vm3, %v1195_v3, %v1874_v11  ;;  %v683_v41 = vsel %vm183_vm4, %v1870_v12, %v1873_v16 }
 0x132   :  { %669 = vrot.lane.b32.xlu2 %v667_v10, %s994_s25  ;;  %v204_v42 = vsel %vm183_vm4, %v1863_v21, %v1865_v24  ;;  %v227_v46 = vsel %vm172_vm2, %v225_v22, %v226_v23  ;;  %v288_v51 = vrot.slane %v1242_v36, 1  ;;  %v289_v52 = vrot.slane %v1242_v36, 2  ;;  %v1332_v21 = vld [vmem:[#allocation2] sm:$0x3] }
 0x133   :  { %625 = vrot.lane.b32.xlu1 %v623_v19, %s995_s26  ;;  %v205_v48 = vsel %vm172_vm2, %v203_v26, %v204_v42  ;;  %v290_v55 = vrot.slane %v1242_v36, 3  ;;  %v684_v56 = vsel %vm172_vm2, %v682_v37, %v683_v41  ;;  %v1859_v59 = vrot.slane %v1258_v43, 1  ;;  %v1285_v19 = vld [vmem:[#allocation2] sm:$0x3] }
 0x134   :  { %v1857_v60 = vrot.slane %v1258_v43, 2  ;;  %v1858_v63 = vrot.slane %v1258_v43, 3  ;;  %v232_v0 = vperm.slane %v227_v46, 0  ;;  %v1862_v5 = vrot.slane %v1262_v47, 1  ;;  %v1297_v26 = vld [vmem:[#allocation2] sm:$0x3] }
 0x135   :  { %581 = vrot.lane.b32.xlu0 %v579_v25, %s996_s27  ;;  %v1860_v6 = vrot.slane %v1262_v47, 2  ;;  %v1861_v7 = vrot.slane %v1262_v47, 3  ;;  %v210_v8 = vperm.slane %v205_v48, 0  ;;  %v291_v10 = vsel %vm181_vm3, %v1242_v36, %v288_v51  ;;  %v1308_v42 = vld [vmem:[#allocation2] sm:$0x3] }
 0x136   :  { %v292_v15 = vsel %vm183_vm4, %v289_v52, %v290_v55  ;;  %v689_v22 = vperm.slane %v684_v56, 0  ;;  %v269_v23 = vsel %vm181_vm3, %v1258_v43, %v1859_v59  ;;  %v270_v25 = vsel %vm183_vm4, %v1857_v60, %v1858_v63  ;;  %v1356_v24 = vld [vmem:[#allocation2] sm:$0x3] }
 0x137   :  { %v247_v37 = vsel %vm181_vm3, %v1262_v47, %v1862_v5  ;;  %v248_v41 = vsel %vm183_vm4, %v1860_v6, %v1861_v7  ;;  %v293_v46 = vsel %vm172_vm2, %v291_v10, %v292_v15  ;;  %v376_v48 = vrot.slane %v1285_v19, 1 }
 0x138   :  { %v1875_v56 = vrot.slane %v1285_v19, 2  ;;  %v1864_v60 = vrot.slane %v1297_v26, 1  ;;  %v1866_v63 = vrot.slane %v1297_v26, 2  ;;  %v1867_v59 = vrot.slane %v1297_v26, 3 }
 0x139   :  { %v1868_v6 = vrot.slane %v1308_v42, 1  ;;  %v1872_v10 = vrot.slane %v1308_v42, 3  ;;  %v249_v15 = vsel %vm172_vm2, %v247_v37, %v248_v41  ;;  %v298_v7 = vperm.slane %v293_v46, 0  ;;  %v1344_v46 = vld [vmem:[#allocation2] sm:$0x3] }
 0x13a   :  { %234 = vrot.lane.b32.xlu2 %v232_v0, %s993_s4  ;;  %v378_v0 = vrot.slane %v1285_v19, 3  ;;  %v335_v37 = vsel %vm181_vm3, %v1297_v26, %v1864_v60  ;;  %v336_v41 = vsel %vm183_vm4, %v1866_v63, %v1867_v59  ;;  %v1878_v59 = vrot.slane %v1332_v21, 1 }
 0x13b   :  { %212 = vrot.lane.b32.xlu1 %v210_v8, %s997_s28  ;;  %v271_v8 = vsel %vm172_vm2, %v269_v23, %v270_v25  ;;  %v379_v23 = vsel %vm181_vm3, %v1285_v19, %v376_v48  ;;  %v1884_v20 = vrot.slane %v1344_v46, 1  ;;  %v1880_v12 = vrot.slane %v1344_v46, 2 }
 0x13c   :  { %v276_v5 = vperm.slane %v271_v8, 0  ;;  %v380_v25 = vsel %vm183_vm4, %v1875_v56, %v378_v0  ;;  %v254_v8 = vperm.slane %v249_v15, 0  ;;  %v1876_v15 = vrot.slane %v1332_v21, 2 }
 0x13d   :  { %691 = vrot.lane.b32.xlu0 %v689_v22, %s998_s29  ;;  %v1871_v22 = vrot.slane %v1308_v42, 2  ;;  %v381_v63 = vsel %vm172_vm2, %v379_v23, %v380_v25  ;;  %v1881_v23 = vrot.slane %v1356_v24, 2  ;;  %v1882_v25 = vrot.slane %v1356_v24, 3 }
 0x13e   :  { %v386_v11 = vperm.slane %v381_v63, 0  ;;  %v1389_v63 = vld [vmem:[#allocation2] sm:$0x3] }
 0x13f   :  { %v314_v60 = vsel %vm183_vm4, %v1871_v22, %v1872_v10  ;;  %v1883_v22 = vrot.slane %v1344_v46, 3  ;;  %v1879_v10 = vrot.slane %v1356_v24, 1 }
 0x142   :  { %300 = vrot.lane.b32.xlu2 %v298_v7, %s999_s30  ;;  %v313_v7 = vsel %vm181_vm3, %v1308_v42, %v1868_v6  ;;  %v337_v6 = vsel %vm172_vm2, %v335_v37, %v336_v41  ;;  %v401_v37 = vsel %vm181_vm3, %v1332_v21, %v1878_v59 }
 0x143   :  { %278 = vrot.lane.b32.xlu1 %v276_v5, %s996_s27  ;;  %v1877_v5 = vrot.slane %v1332_v21, 3  ;;  %v315_v16 = vsel %vm172_vm2, %v313_v7, %v314_v60  ;;  %v342_v56 = vperm.slane %v337_v6, 0  ;;  %v446_v60 = vsel %vm183_vm4, %v1880_v12, %v1883_v22  ;;  %v1407_v12 = vld [vmem:[#allocation2] sm:$0x3] }
 0x144   :  { %v357_v6 = vsel %vm181_vm3, %v1356_v24, %v1879_v10  ;;  %v358_v7 = vsel %vm183_vm4, %v1881_v23, %v1882_v25  ;;  %v464_v10 = vrot.slane %v1389_v63, 1  ;;  %v641_v23 = vsel %vm186_vm5, %v1119_v27, %v635_v28 }
 0x145   :  { %256 = vrot.lane.b32.xlu0 %v254_v8, %s1000_s12  ;;  %v402_v41 = vsel %vm183_vm4, %v1876_v15, %v1877_v5  ;;  %v445_v8 = vsel %vm181_vm3, %v1344_v46, %v1884_v20  ;;  %v320_v15 = vperm.slane %v315_v16, 0  ;;  %v1402_v5 = vld [vmem:[#allocation2] sm:$0x3]  ;;  %v359_v16 = vsel %vm172_vm2, %v357_v6, %v358_v7 }
 0x146   :  { %v447_v59 = vsel %vm172_vm2, %v445_v8, %v446_v60  ;;  %v466_v25 = vrot.slane %v1389_v63, 3  ;;  %v509_v8 = vrot.slane %v1402_v5, 2  ;;  %v510_v28 = vrot.slane %v1402_v5, 3 }
 0x147   :  { %v1885_v60 = vrot.slane %v1407_v12, 1  ;;  %v1886_v6 = vrot.slane %v1407_v12, 2  ;;  %v1887_v7 = vrot.slane %v1407_v12, 3  ;;  %v452_v22 = vperm.slane %v447_v59, 0 }
 0x148   :  { %v364_v27 = vperm.slane %v359_v16, 0  ;;  %v663_v16 = vsel %vm186_vm5, %v1142_v40, %v657_v49  ;;  %v553_v40 = vsel %vm186_vm5, %v1129_v35, %v547_v38  ;;  %v554_v49 = vsel %vm188_vm6, %v548_v39, %v549_v44 }
 0x149   :  { %v229_v38 = vsel %vm188_vm6, %v223_v17, %v224_v18  ;;  %v575_v39 = vsel %vm186_vm5, %v1163_v50, %v569_v62  ;;  %v576_v44 = vsel %vm188_vm6, %v570_v1, %v571_v2  ;;  %v294_v62 = vsel %vm186_vm5, %v1242_v36, %v288_v51 }
 0x14a   :  { %388 = vrot.lane.b32.xlu2 %v386_v11, %s1001_s5  ;;  %v403_v11 = vsel %vm172_vm2, %v401_v37, %v402_v41  ;;  %v642_v37 = vsel %vm188_vm6, %v636_v29, %v637_v30  ;;  %v508_v41 = vrot.slane %v1402_v5, 1  ;;  %v467_v29 = vsel %vm181_vm3, %v1389_v63, %v464_v10 }
 0x14b   :  { %344 = vrot.lane.b32.xlu1 %v342_v56, %s1002_s13  ;;  %v1888_v56 = vrot.slane %v1389_v63, 2  ;;  %v408_v20 = vperm.slane %v403_v11, 0  ;;  %v424_v11 = vsel %vm183_vm4, %v1886_v6, %v1887_v7  ;;  %v577_v50 = vsel %vm190_vm7, %v575_v39, %v576_v44  ;;  %v176_v44 = vld [vmem:[#allocation2] sm:$0x3] }
 0x14c   :  { %v511_v59 = vsel %vm181_vm3, %v1402_v5, %v508_v41  ;;  %v295_v17 = vsel %vm188_vm6, %v289_v52, %v290_v55  ;;  %v619_v51 = vsel %vm186_vm5, %v1155_v45, %v613_v57  ;;  %v578_v36 = vrot.slane %v577_v50, 1 }
 0x14d   :  { %322 = vrot.lane.b32.xlu0 %v320_v15, %s992_s3  ;;  %v1426_v15 = vsel %vm190_vm7, %v641_v23, %v642_v37  ;;  %v468_v30 = vsel %vm183_vm4, %v1888_v56, %v466_v25  ;;  %v423_v23 = vsel %vm181_vm3, %v1407_v12, %v1885_v60  ;;  %v664_v37 = vsel %vm188_vm6, %v658_v53, %v659_v54 }
 0x14e   :  { %v1472_v60 = vsel %vm190_vm7, %v663_v16, %v664_v37  ;;  %v469_v6 = vsel %vm172_vm2, %v467_v29, %v468_v30  ;;  %v425_v56 = vsel %vm172_vm2, %v423_v23, %v424_v11  ;;  %v228_v53 = vsel %vm186_vm5, %v1197_v4, %v222_v14  ;;  %v528_v11 = vld [vmem:[#allocation2 + $0x2] sm:$0x3] }
 0x14f   :  { %v1509_v14 = vsel %vm190_vm7, %v228_v53, %v229_v38  ;;  %v430_v30 = vperm.slane %v425_v56, 0  ;;  %v555_v4 = vsel %vm190_vm7, %v553_v40, %v554_v49  ;;  %v620_v56 = vsel %vm188_vm6, %v614_v58, %v615_v61 }
 0x150   :  { %v556_v18 = vrot.slane %v555_v4, 1  ;;  %v382_v57 = vsel %vm186_vm5, %v1285_v19, %v376_v48  ;;  %v621_v55 = vsel %vm190_vm7, %v619_v51, %v620_v56  ;;  %v597_v45 = vsel %vm186_vm5, %v1124_v31, %v591_v32 }
 0x151   :  { %v598_v58 = vsel %vm188_vm6, %v592_v33, %v593_v34  ;;  %v1889_v61 = vrot.slane %v1285_v19, 2  ;;  %v622_v32 = vrot.slane %v621_v55, 1  ;;  %v1890_v31 = vrot.slane %v1344_v46, 1 }
 0x152   :  { %454 = vrot.lane.b32.xlu2 %v452_v22, %s994_s25  ;;  %v512_v22 = vsel %vm183_vm4, %v509_v8, %v510_v28  ;;  %v558_v48 = vperm.slane %v556_v18, 0  ;;  %v599_v16 = vsel %vm190_vm7, %v597_v45, %v598_v58  ;;  %v1891_v34 = vrot.slane %v1344_v46, 3 }
 0x153   :  { %366 = vrot.lane.b32.xlu1 %v364_v27, %s995_s26  ;;  %v1469_v27 = vld [vmem:[#allocation2] sm:$0x3]  ;;  %v513_v7 = vsel %vm172_vm2, %v511_v59, %v512_v22  ;;  %v474_v59 = vperm.slane %v469_v6, 0  ;;  %v1543_v6 = vsel %vm190_vm7, %v294_v62, %v295_v17  ;;  %v448_v33 = vsel %vm186_vm5, %v1344_v46, %v1890_v31 }
 0x154   :  { %v486_v54 = vrot.slane %v1469_v27, 1  ;;  %v488_v29 = vrot.slane %v1469_v27, 3  ;;  %v518_v35 = vperm.slane %v513_v7, 0  ;;  %v383_v7 = vsel %vm188_vm6, %v1889_v61, %v378_v0 }
 0x155   :  { %410 = vrot.lane.b32.xlu0 %v408_v20, %s991_s2  ;;  %v487_v20 = vrot.slane %v1469_v27, 2  ;;  %v1567_v22 = vsel %vm190_vm7, %v382_v57, %v383_v7  ;;  %v1892_v19 = vrot.slane %v1344_v46, 2  ;;  %v580_v37 = vperm.slane %v578_v36, 0 }
 0x156   :  { %v489_v1 = vsel %vm181_vm3, %v1469_v27, %v486_v54  ;;  %v1893_v40 = vrot.slane %v1195_v3, 1  ;;  %v1894_v53 = vrot.slane %v1195_v3, 3  ;;  %v1895_v38 = vrot.slane %v1195_v3, 2 }
 0x157   :  { %v490_v2 = vsel %vm183_vm4, %v487_v20, %v488_v29  ;;  %v449_v0 = vsel %vm188_vm6, %v1892_v19, %v1891_v34  ;;  %v644_v46 = vrot.slane %v1426_v15, 1  ;;  %v514_v4 = vsel %vm186_vm5, %v1402_v5, %v508_v41 }
 0x158   :  { %v491_v52 = vsel %vm172_vm2, %v489_v1, %v490_v2  ;;  %v685_v49 = vsel %vm186_vm5, %v1195_v3, %v1893_v40  ;;  %v1591_v39 = vsel %vm190_vm7, %v448_v33, %v449_v0  ;;  %v515_v3 = vsel %vm188_vm6, %v509_v8, %v510_v28 }
 0x159   :  { %v496_v23 = vperm.slane %v491_v52, 0  ;;  %v624_v62 = vperm.slane %v622_v32, 0  ;;  %v1896_v15 = vrot.slane %v1215_v9, 1  ;;  %v1610_v2 = vsel %vm190_vm7, %v514_v4, %v515_v3 }
 0x15a   :  { %520 = vrot.lane.b32.xlu2 %v518_v35, %s1003_s14  ;;  %v686_v35 = vsel %vm188_vm6, %v1895_v38, %v1894_v53  ;;  %v1897_v41 = vrot.slane %v1215_v9, 3  ;;  %v1898_v17 = vrot.slane %v1215_v9, 2  ;;  %v531_v8 = vrot.slane %v528_v11, 2 }
 0x15b   :  { %432 = vrot.lane.b32.xlu1 %v430_v30, %s1004_s0  ;;  %v600_v30 = vrot.slane %v599_v16, 1  ;;  %v687_v50 = vsel %vm190_vm7, %v685_v49, %v686_v35  ;;  %v206_v1 = vsel %vm186_vm5, %v1215_v9, %v1896_v15  ;;  %v532_v28 = vrot.slane %v528_v11, 3 }
 0x15c   :  { %v207_v5 = vsel %vm188_vm6, %v1898_v17, %v1897_v41  ;;  %v178_v51 = vrot.slane %v176_v44, 1  ;;  %v179_v56 = vrot.slane %v176_v44, 2  ;;  %v180_v36 = vrot.slane %v176_v44, 3 }
 0x15d   :  { %476 = vrot.lane.b32.xlu0 %v474_v59, %s1005_s15  ;;  %v530_v59 = vrot.slane %v528_v11, 1  ;;  %v602_v52 = vperm.slane %v600_v30, 0  ;;  %v534_v57 = vsel %vm183_vm4, %v531_v8, %v532_v28  ;;  %v537_v61 = vsel %vm188_vm6, %v531_v8, %v532_v28 }
 0x15e   :  { %v182_v45 = vsel %vm181_vm3, %v176_v44, %v178_v51  ;;  %v184_v58 = vsel %vm183_vm4, %v179_v56, %v180_v36  ;;  %v646_v7 = vperm.slane %v644_v46, 0  ;;  %v688_v32 = vrot.slane %v687_v50, 1 }
 0x15f   :  { %v533_v18 = vsel %vm181_vm3, %v528_v11, %v530_v59  ;;  %v536_v55 = vsel %vm186_vm5, %v528_v11, %v530_v59  ;;  %v187_v11 = vsel %vm186_vm5, %v176_v44, %v178_v51  ;;  %v208_v16 = vsel %vm190_vm7, %v206_v1, %v207_v5 }
 0x160   :  { %v535_v9 = vsel %vm172_vm2, %v533_v18, %v534_v57  ;;  %v189_v33 = vsel %vm188_vm6, %v179_v56, %v180_v36  ;;  %v666_v34 = vrot.slane %v1472_v60, 1  ;;  %v1899_v0 = vrot.slane %v1262_v47, 1 }
 0x161   :  { %543 = vst.msk [vmem:[#allocation4] sm:$0x1] %vm542_vm8, %v535_v9  ;;  %v191_v19 = vsel %vm190_vm7, %v187_v11, %v189_v33  ;;  %v1900_v40 = vrot.slane %v1262_v47, 3  ;;  %v1901_v49 = vrot.slane %v1262_v47, 2  ;;  %v209_v35 = vrot.slane %v208_v16, 1 }
 0x162   :  { %561 = vrot.lane.b32.xlu2 %v558_v48, %s993_s4  ;;  %v185_v48 = vsel %vm172_vm2, %v182_v45, %v184_v58  ;;  %v192_v38 = vrot.slane %v191_v19, 1  ;;  %v690_v46 = vperm.slane %v688_v32, 0  ;;  %v668_v60 = vperm.slane %v666_v34, 0 }
 0x163   :  { %498 = vrot.lane.b32.xlu1 %v496_v23, %s998_s29  ;;  %v538_v23 = vsel %vm190_vm7, %v536_v55, %v537_v61  ;;  %196 = vst.msk [vmem:[#allocation3] sm:$0x1] %vm195_vm9, %v185_v48  ;;  %v251_v53 = vsel %vm188_vm6, %v1901_v49, %v1900_v40  ;;  %v1902_v30 = vrot.slane %v1258_v43, 1  ;;  %v1903_v3 = vrot.slane %v1258_v43, 3 }
 0x164   :  { %v539_v31 = vrot.slane %v538_v23, 1  ;;  %197 = vst.msk [vmem:[#allocation3 + $0x10] sm:$0x1] %vm195_vm9, %v192_v38  ;;  %v231_v1 = vrot.slane %v1509_v14, 1  ;;  %v1905_v41 = vrot.slane %v1308_v42, 1  ;;  %v1907_v5 = vrot.slane %v1308_v42, 2 }
 0x165   :  { %583 = vrot.lane.b32.xlu0 %v580_v37, %s996_s27  ;;  %v250_v37 = vsel %vm186_vm5, %v1262_v47, %v1899_v0  ;;  %v272_v4 = vsel %vm186_vm5, %v1258_v43, %v1902_v30  ;;  %v1904_v47 = vrot.slane %v1258_v43, 2  ;;  %v1906_v43 = vrot.slane %v1308_v42, 3 }
 0x166   :  { %544 = vst.msk [vmem:[#allocation4 + $0x8] sm:$0x1] %vm542_vm8, %v539_v31  ;;  %v252_v44 = vsel %vm190_vm7, %v250_v37, %v251_v53  ;;  %v316_v17 = vsel %vm186_vm5, %v1308_v42, %v1905_v41  ;;  %v233_v51 = vperm.slane %v231_v1, 0  ;;  %v1908_v36 = vrot.slane %v1297_v26, 1 }
 0x167   :  { %v273_v59 = vsel %vm188_vm6, %v1904_v47, %v1903_v3  ;;  %v253_v50 = vrot.slane %v252_v44, 1  ;;  %v317_v8 = vsel %vm188_vm6, %v1907_v5, %v1906_v43  ;;  %v1910_v57 = vrot.slane %v1297_v26, 2 }
 0x168   :  { %v274_v15 = vsel %vm190_vm7, %v272_v4, %v273_v59  ;;  %v318_v56 = vsel %vm190_vm7, %v316_v17, %v317_v8  ;;  %v338_v14 = vsel %vm186_vm5, %v1297_v26, %v1908_v36  ;;  %v297_v58 = vrot.slane %v1543_v6, 1  ;;  %v701_v36 = vld [vmem:[%s1853_s8] sm:$0xff] }
 0x169   :  { %v275_v28 = vrot.slane %v274_v15, 1  ;;  %v255_v18 = vperm.slane %v253_v50, 0  ;;  %v319_v9 = vrot.slane %v318_v56, 1  ;;  %v1911_v61 = vrot.slane %v1332_v21, 1  ;;  %726 = vmatpush.msra.mxu0 %v701_v36  ;;  %898 = vmatpush.msrb.mxu2 %v701_v36 }
 0x16a   :  { %627 = vrot.lane.b32.xlu2 %v624_v62, %s995_s26  ;;  %v211_v62 = vperm.slane %v209_v35, 0  ;;  %v1913_v48 = vrot.slane %v1332_v21, 2  ;;  %v299_v16 = vperm.slane %v297_v58, 0  ;;  %v1914_v33 = vrot.slane %v1356_v24, 1 }
 0x16b   :  { %605 = vrot.lane.b32.xlu1 %v602_v52, %s992_s3  ;;  %v1909_v52 = vrot.slane %v1297_v26, 3  ;;  %v277_v42 = vperm.slane %v275_v28, 0  ;;  %v1912_v26 = vrot.slane %v1332_v21, 3  ;;  %v321_v32 = vperm.slane %v319_v9, 0 }
 0x16c   :  { %v360_v6 = vsel %vm186_vm5, %v1356_v24, %v1914_v33  ;;  %v1915_v34 = vrot.slane %v1356_v24, 3  ;;  %v1916_v19 = vrot.slane %v1356_v24, 2  ;;  %v385_v53 = vrot.slane %v1567_v22, 1 }
 0x16d   :  { %649 = vrot.lane.b32.xlu0 %v646_v7, %s991_s2  ;;  %v339_v55 = vsel %vm188_vm6, %v1910_v57, %v1909_v52  ;;  %v404_v7 = vsel %vm186_vm5, %v1332_v21, %v1911_v61  ;;  %v405_v23 = vsel %vm188_vm6, %v1913_v48, %v1912_v26  ;;  %v470_v24 = vsel %vm186_vm5, %v1389_v63, %v464_v10  ;;  %v700_v26 = vld [vmem:[%s1852_s7 + $0x8] sm:$0xff] }
 0x16e   :  { %v340_v45 = vsel %vm190_vm7, %v338_v14, %v339_v55  ;;  %v406_v31 = vsel %vm190_vm7, %v404_v7, %v405_v23  ;;  %v361_v0 = vsel %vm188_vm6, %v1916_v19, %v1915_v34  ;;  %v1917_v38 = vrot.slane %v1389_v63, 2  ;;  %v699_v14 = vld [vmem:[%s1852_s7] sm:$0xff]  ;;  %893 = vmatmul.msk.f32.vlgmr.msrb.gmra.mxu2 %vm704_vm10, %v700_v26 }
 0x16f   :  { %v341_v11 = vrot.slane %v340_v45, 1  ;;  %v407_v40 = vrot.slane %v406_v31, 1  ;;  %v362_v49 = vsel %vm190_vm7, %v360_v6, %v361_v0  ;;  %v387_v44 = vperm.slane %v385_v53, 0  ;;  %892 = vmatmul.msk.f32.vlgmr.msra.gmra.mxu0 %vm704_vm10, %v699_v14 }
 0x170   :  { %v471_v35 = vsel %vm188_vm6, %v1917_v38, %v466_v25  ;;  %v1918_v4 = vrot.slane %v1407_v12, 1  ;;  %v1919_v3 = vrot.slane %v1407_v12, 3  ;;  %v1920_v10 = vrot.slane %v1407_v12, 2 }
 0x171   :  { %v343_v21 = vperm.slane %v341_v11, 0  ;;  %v472_v30 = vsel %vm190_vm7, %v470_v24, %v471_v35  ;;  %v451_v50 = vrot.slane %v1591_v39, 1  ;;  %v492_v41 = vsel %vm186_vm5, %v1469_v27, %v486_v54 }
 0x172   :  { %693 = vrot.lane.b32.xlu2 %v690_v46, %s998_s29  ;;  %v363_v46 = vrot.slane %v362_v49, 1  ;;  %v426_v22 = vsel %vm186_vm5, %v1407_v12, %v1918_v4  ;;  %v427_v47 = vsel %vm188_vm6, %v1920_v10, %v1919_v3  ;;  %v473_v59 = vrot.slane %v472_v30, 1 }
 0x173   :  { %671 = vrot.lane.b32.xlu1 %v668_v60, %s994_s25  ;;  %v409_v60 = vperm.slane %v407_v40, 0  ;;  %v453_v12 = vperm.slane %v451_v50, 0  ;;  %v493_v17 = vsel %vm188_vm6, %v487_v20, %v488_v29  ;;  %v517_v54 = vrot.slane %v1610_v2, 1 }
 0x174   :  { %v365_v63 = vperm.slane %v363_v46, 0  ;;  %v475_v1 = vperm.slane %v473_v59, 0  ;;  %v494_v5 = vsel %vm190_vm7, %v492_v41, %v493_v17  ;;  %v702_v41 = vld [vmem:[%s1854_s9] sm:$0xff] }
 0x175   :  { %214 = vrot.lane.b32.xlu0 %v211_v62, %s997_s28  ;;  %v428_v62 = vsel %vm190_vm7, %v426_v22, %v427_v47  ;;  %v495_v8 = vrot.slane %v494_v5, 1  ;;  %v519_v28 = vperm.slane %v517_v54, 0  ;;  %s871_s28 = sshll.u32 %s1856_s11, 4  ;;  %s872_s28 = int_to_ptr.hbm [resolvable:$true] %s871_s28 }
 0x176   :  { %v429_v15 = vrot.slane %v428_v62, 1 }
 0x178   :  { %v431_v43 = vperm.slane %v429_v15, 0 }
 0x17a   :  { %258 = vrot.lane.b32.xlu2 %v255_v18, %s1000_s12  ;;  %v497_v18 = vperm.slane %v495_v8, 0 }
 0x17b   :  { %236 = vrot.lane.b32.xlu1 %v233_v51, %s993_s4 }
 0x17d   :  { %280 = vrot.lane.b32.xlu0 %v277_v42, %s996_s27  ;;  %v917_v42 = vld [vmem:[%s1851_s6] ss:$0 sm:$0xff] }
 0x17e   :  { %v1774_v58 = vadd.f32 %v917_v42, %v1108_v13 }
 0x180   :  { %v73_v48 = vsel %vm72_vm11, %v1774_v58, -inf }
 0x182   :  { %324 = vrot.lane.b32.xlu2 %v321_v32, %s992_s3  ;;  %s1006_s3 = smov [#allocation5]  }
 0x183   :  { %302 = vrot.lane.b32.xlu1 %v299_v16, %s999_s30  ;;  %s859_s4 = sshll.u32 %s1006_s3, 4  ;;  %s860_s4 = int_to_ptr.vmem [resolvable:$true] %s859_s4 }
 0x184   :  { %v648_v37 = vpop.permute.xlu2 %647 }
 0x185   :  { %346 = vrot.lane.b32.xlu0 %v343_v21, %s1002_s13  ;;  %653 = vst.msk [vmem:[#allocation4 + $0x5] sm:$0x1] %vm542_vm8, %v648_v37 }
 0x18a   :  { %412 = vrot.lane.b32.xlu2 %v409_v60, %s991_s2  ;;  %s861_s2 = sshll.u32 %s1855_s10, 4  ;;  %s1007_s10 = smov [#allocation7]   ;;  %s862_s2 = int_to_ptr.hbm [resolvable:$true] %s861_s2 }
 0x18b   :  { %390 = vrot.lane.b32.xlu1 %v387_v44, %s1001_s5 }
 0x18c   :  { %v670_v25 = vpop.permute.xlu2 %669 }
 0x18d   :  { %368 = vrot.lane.b32.xlu0 %v365_v63, %s995_s26  ;;  %675 = vst.msk [vmem:[#allocation4 + $0x6] sm:$0x1] %vm542_vm8, %v670_v25 }
 0x192   :  { %478 = vrot.lane.b32.xlu2 %v475_v1, %s1005_s15 }
 0x193   :  { %456 = vrot.lane.b32.xlu1 %v453_v12, %s994_s25  ;;  %s869_s25 = sshll.u32 %s1007_s10, 4  ;;  %s870_s25 = int_to_ptr.vmem [resolvable:$true] %s869_s25 }
 0x194   :  { %v235_v39 = vpop.permute.xlu2 %234 }
 0x195   :  { %434 = vrot.lane.b32.xlu0 %v431_v43, %s1004_s0  ;;  %240 = vst.msk [vmem:[#allocation3 + $0x2] sm:$0x1] %vm195_vm9, %v235_v39 }
 0x19b   :  { %522 = vrot.lane.b32.xlu1 %v519_v28, %s1003_s14 }
 0x19c   :  { %v301_v27 = vpop.permute.xlu2 %300 }
 0x19d   :  { %500 = vrot.lane.b32.xlu0 %v497_v18, %s998_s29  ;;  %v604_v20 = vpop.permute.xlu1 %603  ;;  %306 = vst.msk [vmem:[#allocation3 + $0x5] sm:$0x1] %vm195_vm9, %v301_v27  ;;  %v703_v27 = vld [vmem:[%s1854_s9 + $0x8] sm:$0xff]  ;;  %s1008_s29 = smov 128  }
 0x19e   :  { %609 = vst.msk [vmem:[#allocation4 + $0x3] sm:$0x1] %vm542_vm8, %v604_v20 }
 0x19f   :  { %v560_v29 = vpop.permute.xlu0 %559 }
 0x1a0   :  { %565 = vst.msk [vmem:[#allocation4 + $0x1] sm:$0x1] %vm542_vm8, %v560_v29 }
 0x1a4   :  { %v389_v51 = vpop.permute.xlu2 %388 }
 0x1a5   :  { %v626_v56 = vpop.permute.xlu1 %625  ;;  %394 = vst.msk [vmem:[#allocation3 + $0x9] sm:$0x1] %vm195_vm9, %v389_v51 }
 0x1a6   :  { %631 = vst.msk [vmem:[#allocation4 + $0x4] sm:$0x1] %vm542_vm8, %v626_v56 }
 0x1a7   :  { %v582_v2 = vpop.permute.xlu0 %581 }
 0x1a8   :  { %587 = vst.msk [vmem:[#allocation4 + $0x2] sm:$0x1] %vm542_vm8, %v582_v2 }
 0x1ac   :  { %v455_v52 = vpop.permute.xlu2 %454 }
 0x1ad   :  { %460 = vst.msk [vmem:[#allocation3 + $0xc] sm:$0x1] %vm195_vm9, %v455_v52  ;;  %v213_v57 = vpop.permute.xlu1 %212 }
 0x1ae   :  { %218 = vst.msk [vmem:[#allocation3 + $0x1] sm:$0x1] %vm195_vm9, %v213_v57 }
 0x1af   :  { %v692_v55 = vpop.permute.xlu0 %691 }
 0x1b0   :  { %697 = vst.msk [vmem:[#allocation4 + $0x7] sm:$0x1] %vm542_vm8, %v692_v55 }
 0x1b4   :  { %v521_v9 = vpop.permute.xlu2 %520 }
 0x1b5   :  { %526 = vst.msk [vmem:[#allocation3 + $0xf] sm:$0x1] %vm195_vm9, %v521_v9  ;;  %v279_v45 = vpop.permute.xlu1 %278 }
 0x1b6   :  { %284 = vst.msk [vmem:[#allocation3 + $0x4] sm:$0x1] %vm195_vm9, %v279_v45 }
 0x1b7   :  { %v257_v61 = vpop.permute.xlu0 %256  ;;  %v738_v7 = vld [vmem:[#allocation4] sm:$0xff] }
 0x1b8   :  { %262 = vst.msk [vmem:[#allocation3 + $0x3] sm:$0x1] %vm195_vm9, %v257_v61  ;;  %761 = vmatpush.msrb.mxu3 %v738_v7 }
 0x1bb   :  { %74 = vmax.xlane.f32.xlu2 %v73_v48 }
 0x1bc   :  { %v562_v13 = vpop.permute.xlu2 %561 }
 0x1bd   :  { %566 = vst.msk [vmem:[#allocation4 + $0x9] sm:$0x1] %vm542_vm8, %v562_v13  ;;  %v345_v23 = vpop.permute.xlu1 %344 }
 0x1be   :  { %350 = vst.msk [vmem:[#allocation3 + $0x7] sm:$0x1] %vm195_vm9, %v345_v23 }
 0x1bf   :  { %v323_v11 = vpop.permute.xlu0 %322 }
 0x1c0   :  { %328 = vst.msk [vmem:[#allocation3 + $0x6] sm:$0x1] %vm195_vm9, %v323_v11 }
 0x1c4   :  { %v628_v32 = vpop.permute.xlu2 %627 }
 0x1c5   :  { %632 = vst.msk [vmem:[#allocation4 + $0xc] sm:$0x1] %vm542_vm8, %v628_v32  ;;  %v367_v16 = vpop.permute.xlu1 %366 }
 0x1c6   :  { %372 = vst.msk [vmem:[#allocation3 + $0x8] sm:$0x1] %vm195_vm9, %v367_v16 }
 0x1c7   :  { %v411_v31 = vpop.permute.xlu0 %410  ;;  %v734_v33 = vld [vmem:[#allocation3] sm:$0xff] }
 0x1c8   :  { %416 = vst.msk [vmem:[#allocation3 + $0xa] sm:$0x1] %vm195_vm9, %v411_v31  ;;  %894 = vmatmul.msk.f32.vlgmr.msrb.gmra.mxu3 %vm704_vm10, %v734_v33 }
 0x1cc   :  { %v694_v6 = vpop.permute.xlu2 %693 }
 0x1cd   :  { %698 = vst.msk [vmem:[#allocation4 + $0xf] sm:$0x1] %vm542_vm8, %v694_v6  ;;  %v433_v34 = vpop.permute.xlu1 %432 }
 0x1ce   :  { %438 = vst.msk [vmem:[#allocation3 + $0xb] sm:$0x1] %vm195_vm9, %v433_v34 }
 0x1cf   :  { %v477_v19 = vpop.permute.xlu0 %476 }
 0x1d0   :  { %482 = vst.msk [vmem:[#allocation3 + $0xd] sm:$0x1] %vm195_vm9, %v477_v19 }
 0x1d4   :  { %v259_v0 = vpop.permute.xlu2 %258 }
 0x1d5   :  { %263 = vst.msk [vmem:[#allocation3 + $0x13] sm:$0x1] %vm195_vm9, %v259_v0  ;;  %v499_v21 = vpop.permute.xlu1 %498 }
 0x1d6   :  { %504 = vst.msk [vmem:[#allocation3 + $0xe] sm:$0x1] %vm195_vm9, %v499_v21 }
 0x1d7   :  { %v584_v37 = vpop.permute.xlu0 %583 }
 0x1d8   :  { %588 = vst.msk [vmem:[#allocation4 + $0xa] sm:$0x1] %vm542_vm8, %v584_v37 }
 0x1dc   :  { %v325_v40 = vpop.permute.xlu2 %324 }
 0x1dd   :  { %329 = vst.msk [vmem:[#allocation3 + $0x16] sm:$0x1] %vm195_vm9, %v325_v40  ;;  %v606_v49 = vpop.permute.xlu1 %605  ;;  %v735_v53 = vld [vmem:[#allocation3 + $0x8] sm:$0xff] }
 0x1de   :  { %610 = vst.msk [vmem:[#allocation4 + $0xb] sm:$0x1] %vm542_vm8, %v606_v49  ;;  %895 = vmatmul.msk.f32.gmra.mxu3 %vm704_vm10, %v735_v53 }
 0x1df   :  { %v650_v24 = vpop.permute.xlu0 %649 }
 0x1e0   :  { %654 = vst.msk [vmem:[#allocation4 + $0xd] sm:$0x1] %vm542_vm8, %v650_v24 }
 0x1e4   :  { %v413_v38 = vpop.permute.xlu2 %412 }
 0x1e5   :  { %417 = vst.msk [vmem:[#allocation3 + $0x1a] sm:$0x1] %vm195_vm9, %v413_v38  ;;  %v672_v35 = vpop.permute.xlu1 %671 }
 0x1e6   :  { %676 = vst.msk [vmem:[#allocation4 + $0xe] sm:$0x1] %vm542_vm8, %v672_v35 }
 0x1e7   :  { %v215_v46 = vpop.permute.xlu0 %214 }
 0x1e8   :  { %219 = vst.msk [vmem:[#allocation3 + $0x11] sm:$0x1] %vm195_vm9, %v215_v46 }
 0x1ec   :  { %v479_v60 = vpop.permute.xlu2 %478  ;;  %v728_v17 = vpop.f32.mrf.mxu0 }
 0x1ed   :  { %483 = vst.msk [vmem:[#allocation3 + $0x1d] sm:$0x1] %vm195_vm9, %v479_v60  ;;  %v237_v44 = vpop.permute.xlu1 %236  ;;  %v739_v30 = vld [vmem:[#allocation4 + $0x8] sm:$0xff]  ;;  %v729_v43 = vadd.f32 %v728_v17, %v702_v41 }
 0x1ee   :  { %241 = vst.msk [vmem:[#allocation3 + $0x12] sm:$0x1] %vm195_vm9, %v237_v44  ;;  %790 = vmatpush.msrb.mxu0 %v739_v30 }
 0x1ef   :  { %v281_v4 = vpop.permute.xlu0 %280 }
 0x1f0   :  { %285 = vst.msk [vmem:[#allocation3 + $0x14] sm:$0x1] %vm195_vm9, %v281_v4 }
 0x1f1   :  { %v731_v20 = vpop.f32.mrf.mxu2 }
 0x1f2   :  { %v732_v29 = vadd.f32 %v731_v20, %v703_v27 }
 0x1f5   :  { %v303_v22 = vpop.permute.xlu1 %302 }
 0x1f6   :  { %307 = vst.msk [vmem:[#allocation3 + $0x15] sm:$0x1] %vm195_vm9, %v303_v22 }
 0x1f7   :  { %v347_v3 = vpop.permute.xlu0 %346 }
 0x1f8   :  { %351 = vst.msk [vmem:[#allocation3 + $0x17] sm:$0x1] %vm195_vm9, %v347_v3 }
 0x1fd   :  { %v391_v10 = vpop.permute.xlu1 %390 }
 0x1fe   :  { %395 = vst.msk [vmem:[#allocation3 + $0x19] sm:$0x1] %vm195_vm9, %v391_v10 }
 0x1ff   :  { %v369_v47 = vpop.permute.xlu0 %368  ;;  %v736_v63 = vld [vmem:[#allocation3 + $0x10] sm:$0xff] }
 0x200   :  { %373 = vst.msk [vmem:[#allocation3 + $0x18] sm:$0x1] %vm195_vm9, %v369_v47  ;;  %896 = vmatmul.msk.f32.vlgmr.msrb.gmra.mxu0 %vm704_vm10, %v736_v63 }
 0x205   :  { %v457_v25 = vpop.permute.xlu1 %456 }
 0x206   :  { %461 = vst.msk [vmem:[#allocation3 + $0x1c] sm:$0x1] %vm195_vm9, %v457_v25 }
 0x207   :  { %v435_v59 = vpop.permute.xlu0 %434 }
 0x208   :  { %439 = vst.msk [vmem:[#allocation3 + $0x1b] sm:$0x1] %vm195_vm9, %v435_v59 }
 0x20d   :  { %v523_v62 = vpop.permute.xlu1 %522 }
 0x20e   :  { %527 = vst.msk [vmem:[#allocation3 + $0x1f] sm:$0x1] %vm195_vm9, %v523_v62 }
 0x20f   :  { %v501_v50 = vpop.permute.xlu0 %500 }
 0x210   :  { %505 = vst.msk [vmem:[#allocation3 + $0x1e] sm:$0x1] %vm195_vm9, %v501_v50 }
 0x217   :  { %v737_v15 = vld [vmem:[#allocation3 + $0x18] sm:$0xff] }
 0x218   :  { %897 = vmatmul.msk.f32.gmra.mxu0 %vm704_vm10, %v737_v15 }
 0x22e   :  { %v75_v1 = vpop.xlane.xlu2 %74 }
 0x22f   :  { %v76_v12 = vsub.f32 %v1774_v58, %v75_v1 }
 0x231   :  { %v77_v39 = vmul.f32 1.442695, %v76_v12 }
 0x233   :  { %919 = vpow2.f32 %v77_v39 }
 0x239   :  { %v920_v28 = vpop.eup %919 }
 0x23a   :  { %v79_v18 = vsel %vm72_vm11, %v920_v28, 0.0 }
 0x24b   :  { %v763_v5 = vpop.f32.mrf.mxu3 }
 0x24c   :  { %v798_v54 = vadd.f32 %v763_v5, %v729_v43 }
 0x24e   :  { %v802_v8 = vsel %vm125_vm1, %v798_v54, -inf }
 0x24f   :  { %803 = vmax.xlane.f32.xlu0 %v802_v8 }
 0x257   :  { %80 = vadd.xlane.f32.xlu0 %v79_v18 }
 0x261   :  { %v766_v51 = vpop.f32.mrf.mxu3 }
 0x262   :  { %v799_v56 = vadd.f32 %v766_v51, %v732_v29 }
 0x264   :  { %v805_v2 = vsel %vm125_vm1, %v799_v56, -inf }
 0x265   :  { %806 = vmax.xlane.f32.xlu1 %v805_v2 }
 0x27d   :  { %v792_v36 = vpop.f32.mrf.mxu0 }
 0x27e   :  { %v800_v14 = vadd.f32 %v792_v36, %v729_v43 }
 0x280   :  { %v808_v52 = vsel %vm125_vm1, %v800_v14, -inf }
 0x281   :  { %809 = vmax.xlane.f32.xlu2 %v808_v52 }
 0x295   :  { %v795_v57 = vpop.f32.mrf.mxu0 }
 0x296   :  { %v801_v55 = vadd.f32 %v795_v57, %v732_v29 }
 0x298   :  { %v811_v42 = vsel %vm125_vm1, %v801_v55, -inf }
 0x299   :  { %812 = vmax.xlane.f32.xlu2 %v811_v42 }
 0x2c2   :  { %v804_v9 = vpop.xlane.xlu0 %803 }
 0x2c3   :  { %v814_v45 = vsub.f32 %v798_v54, %v804_v9 }
 0x2c5   :  { %v818_v58 = vmul.f32 1.442695, %v814_v45 }
 0x2c7   :  { %921 = vpow2.f32 %v818_v58 }
 0x2ca   :  { %v81_v32 = vpop.xlane.xlu0 %80 }
 0x2cd   :  { %v922_v61 = vpop.eup %921 }
 0x2ce   :  { %v826_v7 = vsel %vm125_vm1, %v922_v61, 0.0 }
 0x2cf   :  { %827 = vadd.xlane.f32.xlu1 %v826_v7 }
 0x2d8   :  { %v807_v26 = vpop.xlane.xlu1 %806 }
 0x2d9   :  { %v815_v48 = vsub.f32 %v799_v56, %v807_v26 }
 0x2db   :  { %v820_v13 = vmul.f32 1.442695, %v815_v48 }
 0x2dd   :  { %923 = vpow2.f32 %v820_v13 }
 0x2de   :  { %925 = vlog2.f32 %v81_v32 }
 0x2e3   :  { %v924_v23 = vpop.eup %923 }
 0x2e4   :  { %v829_v11 = vsel %vm125_vm1, %v924_v23, 0.0  ;;  %v926_v16 = vpop.eup %925 }
 0x2e5   :  { %830 = vadd.xlane.f32.xlu2 %v829_v11  ;;  %v83_v31 = vmul.f32 0.6931472, %v926_v16 }
 0x2e7   :  { %v84_v19 = vsub.f32 %v76_v12, %v83_v31 }
 0x2e9   :  { %85 = vst.msk [vmem:[#allocation5] sm:$0x3] %vm72_vm11, %v84_v19 }
 0x2ea   :  { %864 = dma.vmem_to_hbm [thread:$0]  %s860_s4, 32, %s862_s2, [#allocation6]  }
 0x2f4   :  { %v810_v33 = vpop.xlane.xlu2 %809 }
 0x2f5   :  { %v816_v6 = vsub.f32 %v800_v14, %v810_v33 }
 0x2f7   :  { %v822_v34 = vmul.f32 1.442695, %v816_v6 }
 0x2f9   :  { %927 = vpow2.f32 %v822_v34 }
 0x2ff   :  { %v928_v0 = vpop.eup %927 }
 0x300   :  { %v832_v21 = vsel %vm125_vm1, %v928_v0, 0.0 }
 0x301   :  { %833 = vadd.xlane.f32.xlu0 %v832_v21 }
 0x30c   :  { %v813_v37 = vpop.xlane.xlu2 %812 }
 0x30d   :  { %v817_v40 = vsub.f32 %v801_v55, %v813_v37 }
 0x30f   :  { %v824_v49 = vmul.f32 1.442695, %v817_v40 }
 0x311   :  { %929 = vpow2.f32 %v824_v49 }
 0x317   :  { %v930_v53 = vpop.eup %929 }
 0x318   :  { %v835_v24 = vsel %vm125_vm1, %v930_v53, 0.0 }
 0x319   :  { %836 = vadd.xlane.f32.xlu1 %v835_v24 }
 0x342   :  { %v828_v38 = vpop.xlane.xlu1 %827 }
 0x343   :  { %931 = vlog2.f32 %v828_v38 }
 0x349   :  { %v932_v35 = vpop.eup %931 }
 0x34a   :  { %v839_v46 = vmul.f32 0.6931472, %v932_v35 }
 0x34c   :  { %v846_v60 = vsub.f32 %v814_v45, %v839_v46 }
 0x34e   :  { %850 = vst.msk [vmem:[#allocation7] sm:$0xff] %vm125_vm1, %v846_v60 }
 0x358   :  { %v831_v44 = vpop.xlane.xlu2 %830 }
 0x359   :  { %933 = vlog2.f32 %v831_v44 }
 0x35f   :  { %v934_v30 = vpop.eup %933 }
 0x360   :  { %v841_v4 = vmul.f32 0.6931472, %v934_v30 }
 0x362   :  { %v847_v22 = vsub.f32 %v815_v48, %v841_v4 }
 0x364   :  { %851 = vst.msk [vmem:[#allocation7 + $0x8] sm:$0xff] %vm125_vm1, %v847_v22 }
 0x374   :  { %v834_v3 = vpop.xlane.xlu0 %833 }
 0x375   :  { %935 = vlog2.f32 %v834_v3 }
 0x37b   :  { %v936_v10 = vpop.eup %935 }
 0x37c   :  { %v843_v47 = vmul.f32 0.6931472, %v936_v10 }
 0x37e   :  { %v848_v63 = vsub.f32 %v816_v6, %v843_v47 }
 0x380   :  { %852 = vst.msk [vmem:[#allocation7 + $0x10] sm:$0xff] %vm125_vm1, %v848_v63 }
 0x38c   :  { %v837_v25 = vpop.xlane.xlu1 %836 }
 0x38d   :  { %937 = vlog2.f32 %v837_v25 }
 0x393   :  { %v938_v59 = vpop.eup %937 }
 0x394   :  { %v845_v62 = vmul.f32 0.6931472, %v938_v59 }
 0x396   :  { %v849_v50 = vsub.f32 %v817_v40, %v845_v62 }
 0x398   :  { %853 = vst.msk [vmem:[#allocation7 + $0x18] sm:$0xff] %vm125_vm1, %v849_v50 }
 0x399   :  { %877 = dma.vmem_to_hbm [thread:$0]  %s870_s25, 512, %s872_s28, [#allocation8], %s1008_s29, %s1008_s29, %s1003_s14  }
 0x39a   :  { %987 = dma.done.wait [#allocation6], 32  }
 0x39b   :  { %988 = vsyncadd [#allocation6], 4294967264 }
 0x39c   :  { %989 = dma.done.wait [#allocation8], 512  }
 0x39d   :  { %990 = vsyncadd [#allocation8], 4294966784 }
 0x39e   :  { %886 = vsyncpa [#allocation6], 1 }
 0x39f   :  { %887 = vsyncpa [#allocation8], 1 }

</bundles_post_ra>
